<compile_context>
chip_gen: v5e
topology: v5e:2x2
jax: 0.10.0
libtpu: 0.0.40
codegen_flags: <defaults>
</compile_context>

<pallas_src>
import functools

import jax
import jax.numpy as jnp
from jax.experimental import pallas as pl
from jax.experimental.pallas import tpu as pltpu


def _round_up(n, m):
    return ((n + m - 1) // m) * m


def _sigmoid_1eup(x):
    # sigmoid(x) == 0.5 * (tanh(0.5 * x) + 1): a single EUP op (tanh) instead
    # of exp + divide on the serial dependency chain.
    return 0.5 * jnp.tanh(0.5 * x) + 0.5


def _lstm_kernel(gx_ref, whh_ref, wfc_ref, bfc_ref, out_ref, h_ref, c_ref,
                 *, hp, ts, t_total, masked, unroll):
    """Recurrence over one chunk of `ts` timesteps for one batch tile.

    gx_ref : (ts, bt, 4*hp) bf16  precomputed x@W_ih^T + bias (time-major)
    whh_ref: (hp, 4*hp)     bf16  W_hh^T, per-gate lane padded
    wfc_ref: (hp, Op)       f32   W_fc^T, padded
    bfc_ref: (1, Op)        f32   b_fc, padded
    out_ref: (bt, Op)       f32
    h_ref/c_ref: (bt, hp)   f32   persistent state scratch (per batch tile)
    """
    chunk = pl.program_id(1)

    @pl.when(chunk == 0)
    def _():
        # h0 = c0 = zeros (matches torch.zeros(layer_dim, B, H)).
        h_ref[...] = jnp.zeros_like(h_ref)
        c_ref[...] = jnp.zeros_like(c_ref)

    base = chunk * ts

    def step(s, carry):
        h, c = carry
        # gates = (x_t @ W_ih^T + b) [precomputed, bf16] + h_{t-1} @ W_hh^T.
        # bf16 MXU operands, f32 accumulation.  W_hh^T is re-read from VMEM
        # (cheap vld) instead of being pinned in vregs across the loop.
        # TODO(synk): hold W_hh^T weight-stationary across the chunk via
        # pltpu.matmul_push_rhs / matmul_acc_lhs / matmul_pop to avoid
        # re-streaming the weight into the MXU every timestep.
        gates = gx_ref[s].astype(jnp.float32) + jnp.dot(
            h.astype(jnp.bfloat16), whh_ref[...],
            preferred_element_type=jnp.float32)
        # Gate slices are lane-aligned because hp is a multiple of 128.
        i_g = _sigmoid_1eup(gates[:, 0 * hp:1 * hp])
        f_g = _sigmoid_1eup(gates[:, 1 * hp:2 * hp])
        g_g = jnp.tanh(gates[:, 2 * hp:3 * hp])
        o_g = _sigmoid_1eup(gates[:, 3 * hp:4 * hp])
        c_new = f_g * c + i_g * g_g
        h_new = o_g * jnp.tanh(c_new)
        if masked:
            # Trailing time-padding: padded steps must not update h/c.
            keep = jnp.full((h.shape[0], 1), base + s, jnp.int32) < t_total
            h_new = jnp.where(keep, h_new, h)
            c_new = jnp.where(keep, c_new, c)
        return h_new, c_new

    h, c = jax.lax.fori_loop(0, ts, step, (h_ref[...], c_ref[...]),
                             unroll=unroll)
    h_ref[...] = h
    c_ref[...] = c

    @pl.when(chunk == pl.num_programs(1) - 1)
    def _():
        # Fused fc(out[:, -1, :]) on the final hidden state (runs once; f32).
        out_ref[...] = (jnp.dot(h, wfc_ref[...],
                                preferred_element_type=jnp.float32)
                        + bfc_ref[...]).astype(out_ref.dtype)


def lstm_regression_forward(x, params, *, max_chunk=128):
    """x: (B, T, D_in) float32.  Returns (B, output_dim) float32."""
    w_ih, w_hh, b_ih, b_hh, w_fc, b_fc = params
    B, T, D_in = x.shape
    H = w_hh.shape[1]            # w_hh: (4H, H)
    O = w_fc.shape[0]            # w_fc: (O, H)

    # ---- padding: sublanes for batch, lanes per gate for hidden, lanes for
    #      the fc output (unmasked lane-dense stores).
    Bp = _round_up(max(B, 8), 8)
    Hp = _round_up(H, 128)
    G = 4 * Hp
    Op = _round_up(O, 128)
    # TODO(synk): when H is tiny (e.g. 32) pack the four gates into
    # round_up(4H,128) lanes and split with an XLU lane-select instead of
    # padding each gate to 128 lanes (saves up to 4x gx bytes / MXU width).
    # Irrelevant for the spec's hidden_dim=100 (same G either way).

    # ---- batch tiling: split into two sublane-aligned tiles so v7x's second
    #      TensorCore runs an independent recurrence ("parallel" axis).  Only
    #      when it costs no extra padding (bf16 gx wants bt % 16 == 0).
    if Bp % 32 == 0:
        nb, bt = 2, Bp // 2
    else:
        nb, bt = 1, Bp
    Bp = nb * bt

    # ---- chunk size + VMEM budget (sized for v7x: 64 MiB physical VMEM,
    #      32 MiB default scoped; comfortably fits v5e/v6e's 128 MiB).
    ts = min(max_chunk, _round_up(T, 8))
    fixed_bytes = (2 * Hp * G * 2                 # W_hh^T bf16, double-buffered
                   + 2 * (Hp * Op + Op) * 4       # W_fc^T + b_fc f32, dbl-buf
                   + 2 * bt * Op * 4              # output block
                   + 2 * bt * Hp * 4)             # h/c scratch
    budget = 32 * 1024 * 1024
    while ts > 8 and fixed_bytes + 2 * ts * bt * G * 2 > budget:
        ts = max(8, ts // 2)
    vmem_need = fixed_bytes + 2 * ts * bt * G * 2
    vmem_limit = int(min(max(vmem_need + (8 << 20), 32 << 20), 48 << 20))
    # TODO(synk): single-buffer the constant-index weight specs
    # (pipeline_mode=pl.Buffered(1)) or DMA them once into scratch to halve
    # their footprint at very large H on v7x.

    Tp = _round_up(T, ts)
    n_chunks = Tp // ts
    masked = Tp != T

    # ---- pad & reorganize LSTM weights: each gate gets its own 128-aligned
    #      lane block of the 4*Hp gate axis (PyTorch gate order i, f, g, o).
    def gate_mat_t(w, in_dim, in_pad):
        # w: (4H, in_dim)  ->  (in_pad, 4*Hp)  == lane-padded W^T
        w4 = w.reshape(4, H, in_dim)
        w4 = jnp.pad(w4, ((0, 0), (0, Hp - H), (0, in_pad - in_dim)))
        return jnp.transpose(w4, (2, 0, 1)).reshape(in_pad, G)

    wih_t = gate_mat_t(w_ih, D_in, D_in)                       # (D_in, G) f32
    whh_t = gate_mat_t(w_hh, H, Hp).astype(jnp.bfloat16)       # (Hp,  G) bf16
    bias = jnp.pad((b_ih + b_hh).reshape(4, H),
                   ((0, 0), (0, Hp - H))).reshape(G)

    wfc_t = jnp.pad(jnp.transpose(w_fc), ((0, Hp - H), (0, Op - O)))  # (Hp, Op)
    bfc = jnp.pad(b_fc, (0, Op - O)).reshape(1, Op)                   # (1, Op)

    # ---- hoist the input projection out of the recurrence: transpose the
    #      *small* input to time-major first, then one big MXU-friendly XLA
    #      matmul that writes gx directly time-major (no transpose copy of the
    #      large (T, Bp, G) tensor).  Store gx in bf16.
    x_p = jnp.pad(x, ((0, Bp - B), (0, 0), (0, 0)))            # (Bp, T, D_in)
    x_tm = jnp.transpose(x_p, (1, 0, 2)).reshape(T * Bp, D_in) # small transpose
    gx = (x_tm @ wih_t + bias).reshape(T, Bp, G)
    if masked:
        gx = jnp.pad(gx, ((0, Tp - T), (0, 0), (0, 0)))
    gx = gx.astype(jnp.bfloat16)                               # (Tp, Bp, G)

    kernel = functools.partial(_lstm_kernel, hp=Hp, ts=ts, t_total=T,
                               masked=masked, unroll=min(8, ts))

    out_p = pl.pallas_call(
        kernel,
        out_shape=jax.ShapeDtypeStruct((Bp, Op), jnp.float32),
        grid_spec=pltpu.PrefetchScalarGridSpec(
            num_scalar_prefetch=0,
            grid=(nb, n_chunks),                    # (batch tiles, time chunks)
            in_specs=[
                pl.BlockSpec((ts, bt, G), lambda b, t: (t, b, 0)),  # gx chunk
                pl.BlockSpec((Hp, G), lambda b, t: (0, 0)),         # W_hh^T bf16
                pl.BlockSpec((Hp, Op), lambda b, t: (0, 0)),        # W_fc^T
                pl.BlockSpec((1, Op), lambda b, t: (0, 0)),         # b_fc
            ],
            out_specs=pl.BlockSpec((bt, Op), lambda b, t: (b, 0)),
            scratch_shapes=[
                pltpu.VMEM((bt, Hp), jnp.float32),   # h state (per batch tile)
                pltpu.VMEM((bt, Hp), jnp.float32),   # c state (per batch tile)
            ],
        ),
        compiler_params=pltpu.CompilerParams(
            # Batch tiles are independent (v7x megacore); time is serial.
            dimension_semantics=("parallel", "arbitrary"),
            vmem_limit_bytes=vmem_limit),
    )(gx, whh_t, wfc_t, bfc)

    return out_p[:B, :O]


def lstm_reference(x, params):
    """Pure-JAX f32 reference for correctness check."""
    w_ih, w_hh, b_ih, b_hh, w_fc, b_fc = params
    B = x.shape[0]
    H = w_hh.shape[1]

    def step(carry, x_t):
        h, c = carry
        gates = x_t @ w_ih.T + h @ w_hh.T + b_ih + b_hh
        i_g, f_g, g_g, o_g = jnp.split(gates, 4, axis=-1)
        i_g = jax.nn.sigmoid(i_g)
        f_g = jax.nn.sigmoid(f_g)
        g_g = jnp.tanh(g_g)
        o_g = jax.nn.sigmoid(o_g)
        c_new = f_g * c + i_g * g_g
        h_new = o_g * jnp.tanh(c_new)
        return (h_new, c_new), None

    h0 = jnp.zeros((B, H), jnp.float32)
    c0 = jnp.zeros((B, H), jnp.float32)
    (h_last, _), _ = jax.lax.scan(step, (h0, c0), jnp.transpose(x, (1, 0, 2)))
    return h_last @ w_fc.T + b_fc


def init_params(key, input_dim, hidden_dim, output_dim):
    # PyTorch default init: U(-1/sqrt(H), 1/sqrt(H)) for LSTM and Linear.
    k = 1.0 / jnp.sqrt(hidden_dim)
    ks = jax.random.split(key, 6)
    w_ih = jax.random.uniform(ks[0], (4 * hidden_dim, input_dim), jnp.float32, -k, k)
    w_hh = jax.random.uniform(ks[1], (4 * hidden_dim, hidden_dim), jnp.float32, -k, k)
    b_ih = jax.random.uniform(ks[2], (4 * hidden_dim,), jnp.float32, -k, k)
    b_hh = jax.random.uniform(ks[3], (4 * hidden_dim,), jnp.float32, -k, k)
    w_fc = jax.random.uniform(ks[4], (output_dim, hidden_dim), jnp.float32, -k, k)
    b_fc = jax.random.uniform(ks[5], (output_dim,), jnp.float32, -k, k)
    return (w_ih, w_hh, b_ih, b_hh, w_fc, b_fc)


if __name__ == "__main__":
    B, T, D_in = 2, 8, 4       # batch, sequence length, input features
    H, O = 32, 1               # hidden_dim, output_dim (small-shape stand-ins)

    key = jax.random.PRNGKey(0)
    k_x, k_p = jax.random.split(key)
    x = jax.random.normal(k_x, (B, T, D_in), jnp.float32)
    params = init_params(k_p, D_in, H, O)

    out = lstm_regression_forward(x, params)
    out = jax.block_until_ready(out)

    ref = lstm_reference(x, params)
    assert out.shape == (B, O), out.shape
    # gx and the recurrent matmul operands are bf16 (per perf review), so
    # compare against the f32 reference with bf16-appropriate tolerance.
    assert jnp.allclose(out, ref, atol=3e-2, rtol=3e-2), (out, ref)

    print("KERNEL_OK")
</pallas_src>

<mosaic_0001>
module attributes {stable_mosaic.version = 11 : i64} {
  func.func @_lstm_kernel(%arg0: i32, %arg1: i32, %arg2: memref<8x8x512xbf16, #tpu.memory_space<vmem>>, %arg3: memref<128x512xbf16, #tpu.memory_space<vmem>>, %arg4: memref<128x128xf32, #tpu.memory_space<vmem>>, %arg5: memref<1x128xf32, #tpu.memory_space<vmem>>, %arg6: memref<8x128xf32, #tpu.memory_space<vmem>>, %arg7: memref<8x128xf32, #tpu.memory_space<vmem>>, %arg8: memref<8x128xf32, #tpu.memory_space<vmem>>) attributes {dimension_semantics = [#tpu.dimension_semantics<parallel>, #tpu.dimension_semantics<arbitrary>], iteration_bounds = array<i64: 1, 1>, scalar_prefetch = 0 : i64, scratch_operands = 2 : i64, tpu.core_type = #tpu.core_type<tc>, window_params = [{transform_indices = @transform_0, window_bounds = array<i64: 8, 8, 512>}, {pipeline_mode = #tpu.pipeline_mode<synchronous>, transform_indices = @transform_1, window_bounds = array<i64: 128, 512>}, {pipeline_mode = #tpu.pipeline_mode<synchronous>, transform_indices = @transform_2, window_bounds = array<i64: 128, 128>}, {pipeline_mode = #tpu.pipeline_mode<synchronous>, transform_indices = @transform_3, window_bounds = array<i64: 1, 128>}, {transform_indices = @transform_4, window_bounds = array<i64: 8, 128>}]} {
    %c0_i32 = arith.constant 0 : i32
    %0 = arith.cmpi eq, %arg1, %c0_i32 : i32
    %1 = arith.extui %0 : i1 to i32
    %c0_i32_0 = arith.constant 0 : i32
    %2 = arith.cmpi ne, %1, %c0_i32_0 : i32
    scf.if %2 {
      %cst_122 = arith.constant 0.000000e+00 : f32
      %322 = vector.broadcast %cst_122 : f32 to vector<8x128xf32>
      %c0_123 = arith.constant 0 : index
      %c0_124 = arith.constant 0 : index
      %323 = vector.load %arg7[%c0_123, %c0_124] : memref<8x128xf32, #tpu.memory_space<vmem>>, vector<8x128xf32>
      tpu.vector_store %arg7[%c0_123, %c0_124], %322 {strides = array<i32>} : memref<8x128xf32, #tpu.memory_space<vmem>>, vector<8x128xf32>,
      %cst_125 = arith.constant 0.000000e+00 : f32
      %324 = vector.broadcast %cst_125 : f32 to vector<8x128xf32>
      %c0_126 = arith.constant 0 : index
      %c0_127 = arith.constant 0 : index
      %325 = vector.load %arg8[%c0_126, %c0_127] : memref<8x128xf32, #tpu.memory_space<vmem>>, vector<8x128xf32>
      tpu.vector_store %arg8[%c0_126, %c0_127], %324 {strides = array<i32>} : memref<8x128xf32, #tpu.memory_space<vmem>>, vector<8x128xf32>,
    } else {
    }
    %c0 = arith.constant 0 : index
    %c0_1 = arith.constant 0 : index
    %3 = vector.load %arg7[%c0, %c0_1] : memref<8x128xf32, #tpu.memory_space<vmem>>, vector<8x128xf32>
    %c0_2 = arith.constant 0 : index
    %c0_3 = arith.constant 0 : index
    %4 = vector.load %arg8[%c0_2, %c0_3] : memref<8x128xf32, #tpu.memory_space<vmem>>, vector<8x128xf32>
    %c0_i32_4 = arith.constant 0 : i32
    %5 = arith.index_cast %c0_i32_4 : i32 to index
    %c0_5 = arith.constant 0 : index
    %c0_6 = arith.constant 0 : index
    %6 = vector.load %arg2[%5, %c0_5, %c0_6] : memref<8x8x512xbf16, #tpu.memory_space<vmem>>, vector<1x8x512xbf16>
    %7 = vector.shape_cast %6 : vector<1x8x512xbf16> to vector<8x512xbf16>
    %8 = arith.extf %7 : vector<8x512xbf16> to vector<8x512xf32>
    %9 = arith.truncf %3 : vector<8x128xf32> to vector<8x128xbf16>
    %c0_7 = arith.constant 0 : index
    %c0_8 = arith.constant 0 : index
    %10 = vector.load %arg3[%c0_7, %c0_8] : memref<128x512xbf16, #tpu.memory_space<vmem>>, vector<128x512xbf16>
    %cst = arith.constant dense<0.000000e+00> : vector<8x512xf32>
    %11 = tpu.matmul %9, %10, %cst {dimension_numbers = #tpu.dot_dimension_numbers<[1], [0], [0], [1], [0, 0, 1, 1], [], []>} : vector<8x128xbf16>, vector<128x512xbf16>, vector<8x512xf32> -> vector<8x512xf32>
    %12 = arith.addf %8, %11 : vector<8x512xf32>
    %13 = vector.extract_strided_slice %12 {offsets = [0, 0], sizes = [8, 128], strides = [1, 1]} : vector<8x512xf32> to vector<8x128xf32>
    %cst_9 = arith.constant 5.000000e-01 : f32
    %14 = vector.broadcast %cst_9 : f32 to vector<8x128xf32>
    %15 = arith.mulf %14, %13 : vector<8x128xf32>
    %16 = math.tanh %15 : vector<8x128xf32>
    %cst_10 = arith.constant 5.000000e-01 : f32
    %17 = vector.broadcast %cst_10 : f32 to vector<8x128xf32>
    %18 = arith.mulf %17, %16 : vector<8x128xf32>
    %cst_11 = arith.constant 5.000000e-01 : f32
    %19 = vector.broadcast %cst_11 : f32 to vector<8x128xf32>
    %20 = arith.addf %18, %19 : vector<8x128xf32>
    %21 = vector.extract_strided_slice %12 {offsets = [0, 128], sizes = [8, 128], strides = [1, 1]} : vector<8x512xf32> to vector<8x128xf32>
    %cst_12 = arith.constant 5.000000e-01 : f32
    %22 = vector.broadcast %cst_12 : f32 to vector<8x128xf32>
    %23 = arith.mulf %22, %21 : vector<8x128xf32>
    %24 = math.tanh %23 : vector<8x128xf32>
    %cst_13 = arith.constant 5.000000e-01 : f32
    %25 = vector.broadcast %cst_13 : f32 to vector<8x128xf32>
    %26 = arith.mulf %25, %24 : vector<8x128xf32>
    %cst_14 = arith.constant 5.000000e-01 : f32
    %27 = vector.broadcast %cst_14 : f32 to vector<8x128xf32>
    %28 = arith.addf %26, %27 : vector<8x128xf32>
    %29 = vector.extract_strided_slice %12 {offsets = [0, 256], sizes = [8, 128], strides = [1, 1]} : vector<8x512xf32> to vector<8x128xf32>
    %30 = math.tanh %29 : vector<8x128xf32>
    %31 = vector.extract_strided_slice %12 {offsets = [0, 384], sizes = [8, 128], strides = [1, 1]} : vector<8x512xf32> to vector<8x128xf32>
    %cst_15 = arith.constant 5.000000e-01 : f32
    %32 = vector.broadcast %cst_15 : f32 to vector<8x128xf32>
    %33 = arith.mulf %32, %31 : vector<8x128xf32>
    %34 = math.tanh %33 : vector<8x128xf32>
    %cst_16 = arith.constant 5.000000e-01 : f32
    %35 = vector.broadcast %cst_16 : f32 to vector<8x128xf32>
    %36 = arith.mulf %35, %34 : vector<8x128xf32>
    %cst_17 = arith.constant 5.000000e-01 : f32
    %37 = vector.broadcast %cst_17 : f32 to vector<8x128xf32>
    %38 = arith.addf %36, %37 : vector<8x128xf32>
    %39 = arith.mulf %28, %4 : vector<8x128xf32>
    %40 = arith.mulf %20, %30 : vector<8x128xf32>
    %41 = arith.addf %39, %40 : vector<8x128xf32>
    %42 = math.tanh %41 : vector<8x128xf32>
    %43 = arith.mulf %38, %42 : vector<8x128xf32>
    %c1_i32 = arith.constant 1 : i32
    %44 = arith.index_cast %c1_i32 : i32 to index
    %c0_18 = arith.constant 0 : index
    %c0_19 = arith.constant 0 : index
    %45 = vector.load %arg2[%44, %c0_18, %c0_19] : memref<8x8x512xbf16, #tpu.memory_space<vmem>>, vector<1x8x512xbf16>
    %46 = vector.shape_cast %45 : vector<1x8x512xbf16> to vector<8x512xbf16>
    %47 = arith.extf %46 : vector<8x512xbf16> to vector<8x512xf32>
    %48 = arith.truncf %43 : vector<8x128xf32> to vector<8x128xbf16>
    %c0_20 = arith.constant 0 : index
    %c0_21 = arith.constant 0 : index
    %49 = vector.load %arg3[%c0_20, %c0_21] : memref<128x512xbf16, #tpu.memory_space<vmem>>, vector<128x512xbf16>
    %cst_22 = arith.constant dense<0.000000e+00> : vector<8x512xf32>
    %50 = tpu.matmul %48, %49, %cst_22 {dimension_numbers = #tpu.dot_dimension_numbers<[1], [0], [0], [1], [0, 0, 1, 1], [], []>} : vector<8x128xbf16>, vector<128x512xbf16>, vector<8x512xf32> -> vector<8x512xf32>
    %51 = arith.addf %47, %50 : vector<8x512xf32>
    %52 = vector.extract_strided_slice %51 {offsets = [0, 0], sizes = [8, 128], strides = [1, 1]} : vector<8x512xf32> to vector<8x128xf32>
    %cst_23 = arith.constant 5.000000e-01 : f32
    %53 = vector.broadcast %cst_23 : f32 to vector<8x128xf32>
    %54 = arith.mulf %53, %52 : vector<8x128xf32>
    %55 = math.tanh %54 : vector<8x128xf32>
    %cst_24 = arith.constant 5.000000e-01 : f32
    %56 = vector.broadcast %cst_24 : f32 to vector<8x128xf32>
    %57 = arith.mulf %56, %55 : vector<8x128xf32>
    %cst_25 = arith.constant 5.000000e-01 : f32
    %58 = vector.broadcast %cst_25 : f32 to vector<8x128xf32>
    %59 = arith.addf %57, %58 : vector<8x128xf32>
    %60 = vector.extract_strided_slice %51 {offsets = [0, 128], sizes = [8, 128], strides = [1, 1]} : vector<8x512xf32> to vector<8x128xf32>
    %cst_26 = arith.constant 5.000000e-01 : f32
    %61 = vector.broadcast %cst_26 : f32 to vector<8x128xf32>
    %62 = arith.mulf %61, %60 : vector<8x128xf32>
    %63 = math.tanh %62 : vector<8x128xf32>
    %cst_27 = arith.constant 5.000000e-01 : f32
    %64 = vector.broadcast %cst_27 : f32 to vector<8x128xf32>
    %65 = arith.mulf %64, %63 : vector<8x128xf32>
    %cst_28 = arith.constant 5.000000e-01 : f32
    %66 = vector.broadcast %cst_28 : f32 to vector<8x128xf32>
    %67 = arith.addf %65, %66 : vector<8x128xf32>
    %68 = vector.extract_strided_slice %51 {offsets = [0, 256], sizes = [8, 128], strides = [1, 1]} : vector<8x512xf32> to vector<8x128xf32>
    %69 = math.tanh %68 : vector<8x128xf32>
    %70 = vector.extract_strided_slice %51 {offsets = [0, 384], sizes = [8, 128], strides = [1, 1]} : vector<8x512xf32> to vector<8x128xf32>
    %cst_29 = arith.constant 5.000000e-01 : f32
    %71 = vector.broadcast %cst_29 : f32 to vector<8x128xf32>
    %72 = arith.mulf %71, %70 : vector<8x128xf32>
    %73 = math.tanh %72 : vector<8x128xf32>
    %cst_30 = arith.constant 5.000000e-01 : f32
    %74 = vector.broadcast %cst_30 : f32 to vector<8x128xf32>
    %75 = arith.mulf %74, %73 : vector<8x128xf32>
    %cst_31 = arith.constant 5.000000e-01 : f32
    %76 = vector.broadcast %cst_31 : f32 to vector<8x128xf32>
    %77 = arith.addf %75, %76 : vector<8x128xf32>
    %78 = arith.mulf %67, %41 : vector<8x128xf32>
    %79 = arith.mulf %59, %69 : vector<8x128xf32>
    %80 = arith.addf %78, %79 : vector<8x128xf32>
    %81 = math.tanh %80 : vector<8x128xf32>
    %82 = arith.mulf %77, %81 : vector<8x128xf32>
    %c2_i32 = arith.constant 2 : i32
    %83 = arith.index_cast %c2_i32 : i32 to index
    %c0_32 = arith.constant 0 : index
    %c0_33 = arith.constant 0 : index
    %84 = vector.load %arg2[%83, %c0_32, %c0_33] : memref<8x8x512xbf16, #tpu.memory_space<vmem>>, vector<1x8x512xbf16>
    %85 = vector.shape_cast %84 : vector<1x8x512xbf16> to vector<8x512xbf16>
    %86 = arith.extf %85 : vector<8x512xbf16> to vector<8x512xf32>
    %87 = arith.truncf %82 : vector<8x128xf32> to vector<8x128xbf16>
    %c0_34 = arith.constant 0 : index
    %c0_35 = arith.constant 0 : index
    %88 = vector.load %arg3[%c0_34, %c0_35] : memref<128x512xbf16, #tpu.memory_space<vmem>>, vector<128x512xbf16>
    %cst_36 = arith.constant dense<0.000000e+00> : vector<8x512xf32>
    %89 = tpu.matmul %87, %88, %cst_36 {dimension_numbers = #tpu.dot_dimension_numbers<[1], [0], [0], [1], [0, 0, 1, 1], [], []>} : vector<8x128xbf16>, vector<128x512xbf16>, vector<8x512xf32> -> vector<8x512xf32>
    %90 = arith.addf %86, %89 : vector<8x512xf32>
    %91 = vector.extract_strided_slice %90 {offsets = [0, 0], sizes = [8, 128], strides = [1, 1]} : vector<8x512xf32> to vector<8x128xf32>
    %cst_37 = arith.constant 5.000000e-01 : f32
    %92 = vector.broadcast %cst_37 : f32 to vector<8x128xf32>
    %93 = arith.mulf %92, %91 : vector<8x128xf32>
    %94 = math.tanh %93 : vector<8x128xf32>
    %cst_38 = arith.constant 5.000000e-01 : f32
    %95 = vector.broadcast %cst_38 : f32 to vector<8x128xf32>
    %96 = arith.mulf %95, %94 : vector<8x128xf32>
    %cst_39 = arith.constant 5.000000e-01 : f32
    %97 = vector.broadcast %cst_39 : f32 to vector<8x128xf32>
    %98 = arith.addf %96, %97 : vector<8x128xf32>
    %99 = vector.extract_strided_slice %90 {offsets = [0, 128], sizes = [8, 128], strides = [1, 1]} : vector<8x512xf32> to vector<8x128xf32>
    %cst_40 = arith.constant 5.000000e-01 : f32
    %100 = vector.broadcast %cst_40 : f32 to vector<8x128xf32>
    %101 = arith.mulf %100, %99 : vector<8x128xf32>
    %102 = math.tanh %101 : vector<8x128xf32>
    %cst_41 = arith.constant 5.000000e-01 : f32
    %103 = vector.broadcast %cst_41 : f32 to vector<8x128xf32>
    %104 = arith.mulf %103, %102 : vector<8x128xf32>
    %cst_42 = arith.constant 5.000000e-01 : f32
    %105 = vector.broadcast %cst_42 : f32 to vector<8x128xf32>
    %106 = arith.addf %104, %105 : vector<8x128xf32>
    %107 = vector.extract_strided_slice %90 {offsets = [0, 256], sizes = [8, 128], strides = [1, 1]} : vector<8x512xf32> to vector<8x128xf32>
    %108 = math.tanh %107 : vector<8x128xf32>
    %109 = vector.extract_strided_slice %90 {offsets = [0, 384], sizes = [8, 128], strides = [1, 1]} : vector<8x512xf32> to vector<8x128xf32>
    %cst_43 = arith.constant 5.000000e-01 : f32
    %110 = vector.broadcast %cst_43 : f32 to vector<8x128xf32>
    %111 = arith.mulf %110, %109 : vector<8x128xf32>
    %112 = math.tanh %111 : vector<8x128xf32>
    %cst_44 = arith.constant 5.000000e-01 : f32
    %113 = vector.broadcast %cst_44 : f32 to vector<8x128xf32>
    %114 = arith.mulf %113, %112 : vector<8x128xf32>
    %cst_45 = arith.constant 5.000000e-01 : f32
    %115 = vector.broadcast %cst_45 : f32 to vector<8x128xf32>
    %116 = arith.addf %114, %115 : vector<8x128xf32>
    %117 = arith.mulf %106, %80 : vector<8x128xf32>
    %118 = arith.mulf %98, %108 : vector<8x128xf32>
    %119 = arith.addf %117, %118 : vector<8x128xf32>
    %120 = math.tanh %119 : vector<8x128xf32>
    %121 = arith.mulf %116, %120 : vector<8x128xf32>
    %c3_i32 = arith.constant 3 : i32
    %122 = arith.index_cast %c3_i32 : i32 to index
    %c0_46 = arith.constant 0 : index
    %c0_47 = arith.constant 0 : index
    %123 = vector.load %arg2[%122, %c0_46, %c0_47] : memref<8x8x512xbf16, #tpu.memory_space<vmem>>, vector<1x8x512xbf16>
    %124 = vector.shape_cast %123 : vector<1x8x512xbf16> to vector<8x512xbf16>
    %125 = arith.extf %124 : vector<8x512xbf16> to vector<8x512xf32>
    %126 = arith.truncf %121 : vector<8x128xf32> to vector<8x128xbf16>
    %c0_48 = arith.constant 0 : index
    %c0_49 = arith.constant 0 : index
    %127 = vector.load %arg3[%c0_48, %c0_49] : memref<128x512xbf16, #tpu.memory_space<vmem>>, vector<128x512xbf16>
    %cst_50 = arith.constant dense<0.000000e+00> : vector<8x512xf32>
    %128 = tpu.matmul %126, %127, %cst_50 {dimension_numbers = #tpu.dot_dimension_numbers<[1], [0], [0], [1], [0, 0, 1, 1], [], []>} : vector<8x128xbf16>, vector<128x512xbf16>, vector<8x512xf32> -> vector<8x512xf32>
    %129 = arith.addf %125, %128 : vector<8x512xf32>
    %130 = vector.extract_strided_slice %129 {offsets = [0, 0], sizes = [8, 128], strides = [1, 1]} : vector<8x512xf32> to vector<8x128xf32>
    %cst_51 = arith.constant 5.000000e-01 : f32
    %131 = vector.broadcast %cst_51 : f32 to vector<8x128xf32>
    %132 = arith.mulf %131, %130 : vector<8x128xf32>
    %133 = math.tanh %132 : vector<8x128xf32>
    %cst_52 = arith.constant 5.000000e-01 : f32
    %134 = vector.broadcast %cst_52 : f32 to vector<8x128xf32>
    %135 = arith.mulf %134, %133 : vector<8x128xf32>
    %cst_53 = arith.constant 5.000000e-01 : f32
    %136 = vector.broadcast %cst_53 : f32 to vector<8x128xf32>
    %137 = arith.addf %135, %136 : vector<8x128xf32>
    %138 = vector.extract_strided_slice %129 {offsets = [0, 128], sizes = [8, 128], strides = [1, 1]} : vector<8x512xf32> to vector<8x128xf32>
    %cst_54 = arith.constant 5.000000e-01 : f32
    %139 = vector.broadcast %cst_54 : f32 to vector<8x128xf32>
    %140 = arith.mulf %139, %138 : vector<8x128xf32>
    %141 = math.tanh %140 : vector<8x128xf32>
    %cst_55 = arith.constant 5.000000e-01 : f32
    %142 = vector.broadcast %cst_55 : f32 to vector<8x128xf32>
    %143 = arith.mulf %142, %141 : vector<8x128xf32>
    %cst_56 = arith.constant 5.000000e-01 : f32
    %144 = vector.broadcast %cst_56 : f32 to vector<8x128xf32>
    %145 = arith.addf %143, %144 : vector<8x128xf32>
    %146 = vector.extract_strided_slice %129 {offsets = [0, 256], sizes = [8, 128], strides = [1, 1]} : vector<8x512xf32> to vector<8x128xf32>
    %147 = math.tanh %146 : vector<8x128xf32>
    %148 = vector.extract_strided_slice %129 {offsets = [0, 384], sizes = [8, 128], strides = [1, 1]} : vector<8x512xf32> to vector<8x128xf32>
    %cst_57 = arith.constant 5.000000e-01 : f32
    %149 = vector.broadcast %cst_57 : f32 to vector<8x128xf32>
    %150 = arith.mulf %149, %148 : vector<8x128xf32>
    %151 = math.tanh %150 : vector<8x128xf32>
    %cst_58 = arith.constant 5.000000e-01 : f32
    %152 = vector.broadcast %cst_58 : f32 to vector<8x128xf32>
    %153 = arith.mulf %152, %151 : vector<8x128xf32>
    %cst_59 = arith.constant 5.000000e-01 : f32
    %154 = vector.broadcast %cst_59 : f32 to vector<8x128xf32>
    %155 = arith.addf %153, %154 : vector<8x128xf32>
    %156 = arith.mulf %145, %119 : vector<8x128xf32>
    %157 = arith.mulf %137, %147 : vector<8x128xf32>
    %158 = arith.addf %156, %157 : vector<8x128xf32>
    %159 = math.tanh %158 : vector<8x128xf32>
    %160 = arith.mulf %155, %159 : vector<8x128xf32>
    %c4_i32 = arith.constant 4 : i32
    %161 = arith.index_cast %c4_i32 : i32 to index
    %c0_60 = arith.constant 0 : index
    %c0_61 = arith.constant 0 : index
    %162 = vector.load %arg2[%161, %c0_60, %c0_61] : memref<8x8x512xbf16, #tpu.memory_space<vmem>>, vector<1x8x512xbf16>
    %163 = vector.shape_cast %162 : vector<1x8x512xbf16> to vector<8x512xbf16>
    %164 = arith.extf %163 : vector<8x512xbf16> to vector<8x512xf32>
    %165 = arith.truncf %160 : vector<8x128xf32> to vector<8x128xbf16>
    %c0_62 = arith.constant 0 : index
    %c0_63 = arith.constant 0 : index
    %166 = vector.load %arg3[%c0_62, %c0_63] : memref<128x512xbf16, #tpu.memory_space<vmem>>, vector<128x512xbf16>
    %cst_64 = arith.constant dense<0.000000e+00> : vector<8x512xf32>
    %167 = tpu.matmul %165, %166, %cst_64 {dimension_numbers = #tpu.dot_dimension_numbers<[1], [0], [0], [1], [0, 0, 1, 1], [], []>} : vector<8x128xbf16>, vector<128x512xbf16>, vector<8x512xf32> -> vector<8x512xf32>
    %168 = arith.addf %164, %167 : vector<8x512xf32>
    %169 = vector.extract_strided_slice %168 {offsets = [0, 0], sizes = [8, 128], strides = [1, 1]} : vector<8x512xf32> to vector<8x128xf32>
    %cst_65 = arith.constant 5.000000e-01 : f32
    %170 = vector.broadcast %cst_65 : f32 to vector<8x128xf32>
    %171 = arith.mulf %170, %169 : vector<8x128xf32>
    %172 = math.tanh %171 : vector<8x128xf32>
    %cst_66 = arith.constant 5.000000e-01 : f32
    %173 = vector.broadcast %cst_66 : f32 to vector<8x128xf32>
    %174 = arith.mulf %173, %172 : vector<8x128xf32>
    %cst_67 = arith.constant 5.000000e-01 : f32
    %175 = vector.broadcast %cst_67 : f32 to vector<8x128xf32>
    %176 = arith.addf %174, %175 : vector<8x128xf32>
    %177 = vector.extract_strided_slice %168 {offsets = [0, 128], sizes = [8, 128], strides = [1, 1]} : vector<8x512xf32> to vector<8x128xf32>
    %cst_68 = arith.constant 5.000000e-01 : f32
    %178 = vector.broadcast %cst_68 : f32 to vector<8x128xf32>
    %179 = arith.mulf %178, %177 : vector<8x128xf32>
    %180 = math.tanh %179 : vector<8x128xf32>
    %cst_69 = arith.constant 5.000000e-01 : f32
    %181 = vector.broadcast %cst_69 : f32 to vector<8x128xf32>
    %182 = arith.mulf %181, %180 : vector<8x128xf32>
    %cst_70 = arith.constant 5.000000e-01 : f32
    %183 = vector.broadcast %cst_70 : f32 to vector<8x128xf32>
    %184 = arith.addf %182, %183 : vector<8x128xf32>
    %185 = vector.extract_strided_slice %168 {offsets = [0, 256], sizes = [8, 128], strides = [1, 1]} : vector<8x512xf32> to vector<8x128xf32>
    %186 = math.tanh %185 : vector<8x128xf32>
    %187 = vector.extract_strided_slice %168 {offsets = [0, 384], sizes = [8, 128], strides = [1, 1]} : vector<8x512xf32> to vector<8x128xf32>
    %cst_71 = arith.constant 5.000000e-01 : f32
    %188 = vector.broadcast %cst_71 : f32 to vector<8x128xf32>
    %189 = arith.mulf %188, %187 : vector<8x128xf32>
    %190 = math.tanh %189 : vector<8x128xf32>
    %cst_72 = arith.constant 5.000000e-01 : f32
    %191 = vector.broadcast %cst_72 : f32 to vector<8x128xf32>
    %192 = arith.mulf %191, %190 : vector<8x128xf32>
    %cst_73 = arith.constant 5.000000e-01 : f32
    %193 = vector.broadcast %cst_73 : f32 to vector<8x128xf32>
    %194 = arith.addf %192, %193 : vector<8x128xf32>
    %195 = arith.mulf %184, %158 : vector<8x128xf32>
    %196 = arith.mulf %176, %186 : vector<8x128xf32>
    %197 = arith.addf %195, %196 : vector<8x128xf32>
    %198 = math.tanh %197 : vector<8x128xf32>
    %199 = arith.mulf %194, %198 : vector<8x128xf32>
    %c5_i32 = arith.constant 5 : i32
    %200 = arith.index_cast %c5_i32 : i32 to index
    %c0_74 = arith.constant 0 : index
    %c0_75 = arith.constant 0 : index
    %201 = vector.load %arg2[%200, %c0_74, %c0_75] : memref<8x8x512xbf16, #tpu.memory_space<vmem>>, vector<1x8x512xbf16>
    %202 = vector.shape_cast %201 : vector<1x8x512xbf16> to vector<8x512xbf16>
    %203 = arith.extf %202 : vector<8x512xbf16> to vector<8x512xf32>
    %204 = arith.truncf %199 : vector<8x128xf32> to vector<8x128xbf16>
    %c0_76 = arith.constant 0 : index
    %c0_77 = arith.constant 0 : index
    %205 = vector.load %arg3[%c0_76, %c0_77] : memref<128x512xbf16, #tpu.memory_space<vmem>>, vector<128x512xbf16>
    %cst_78 = arith.constant dense<0.000000e+00> : vector<8x512xf32>
    %206 = tpu.matmul %204, %205, %cst_78 {dimension_numbers = #tpu.dot_dimension_numbers<[1], [0], [0], [1], [0, 0, 1, 1], [], []>} : vector<8x128xbf16>, vector<128x512xbf16>, vector<8x512xf32> -> vector<8x512xf32>
    %207 = arith.addf %203, %206 : vector<8x512xf32>
    %208 = vector.extract_strided_slice %207 {offsets = [0, 0], sizes = [8, 128], strides = [1, 1]} : vector<8x512xf32> to vector<8x128xf32>
    %cst_79 = arith.constant 5.000000e-01 : f32
    %209 = vector.broadcast %cst_79 : f32 to vector<8x128xf32>
    %210 = arith.mulf %209, %208 : vector<8x128xf32>
    %211 = math.tanh %210 : vector<8x128xf32>
    %cst_80 = arith.constant 5.000000e-01 : f32
    %212 = vector.broadcast %cst_80 : f32 to vector<8x128xf32>
    %213 = arith.mulf %212, %211 : vector<8x128xf32>
    %cst_81 = arith.constant 5.000000e-01 : f32
    %214 = vector.broadcast %cst_81 : f32 to vector<8x128xf32>
    %215 = arith.addf %213, %214 : vector<8x128xf32>
    %216 = vector.extract_strided_slice %207 {offsets = [0, 128], sizes = [8, 128], strides = [1, 1]} : vector<8x512xf32> to vector<8x128xf32>
    %cst_82 = arith.constant 5.000000e-01 : f32
    %217 = vector.broadcast %cst_82 : f32 to vector<8x128xf32>
    %218 = arith.mulf %217, %216 : vector<8x128xf32>
    %219 = math.tanh %218 : vector<8x128xf32>
    %cst_83 = arith.constant 5.000000e-01 : f32
    %220 = vector.broadcast %cst_83 : f32 to vector<8x128xf32>
    %221 = arith.mulf %220, %219 : vector<8x128xf32>
    %cst_84 = arith.constant 5.000000e-01 : f32
    %222 = vector.broadcast %cst_84 : f32 to vector<8x128xf32>
    %223 = arith.addf %221, %222 : vector<8x128xf32>
    %224 = vector.extract_strided_slice %207 {offsets = [0, 256], sizes = [8, 128], strides = [1, 1]} : vector<8x512xf32> to vector<8x128xf32>
    %225 = math.tanh %224 : vector<8x128xf32>
    %226 = vector.extract_strided_slice %207 {offsets = [0, 384], sizes = [8, 128], strides = [1, 1]} : vector<8x512xf32> to vector<8x128xf32>
    %cst_85 = arith.constant 5.000000e-01 : f32
    %227 = vector.broadcast %cst_85 : f32 to vector<8x128xf32>
    %228 = arith.mulf %227, %226 : vector<8x128xf32>
    %229 = math.tanh %228 : vector<8x128xf32>
    %cst_86 = arith.constant 5.000000e-01 : f32
    %230 = vector.broadcast %cst_86 : f32 to vector<8x128xf32>
    %231 = arith.mulf %230, %229 : vector<8x128xf32>
    %cst_87 = arith.constant 5.000000e-01 : f32
    %232 = vector.broadcast %cst_87 : f32 to vector<8x128xf32>
    %233 = arith.addf %231, %232 : vector<8x128xf32>
    %234 = arith.mulf %223, %197 : vector<8x128xf32>
    %235 = arith.mulf %215, %225 : vector<8x128xf32>
    %236 = arith.addf %234, %235 : vector<8x128xf32>
    %237 = math.tanh %236 : vector<8x128xf32>
    %238 = arith.mulf %233, %237 : vector<8x128xf32>
    %c6_i32 = arith.constant 6 : i32
    %239 = arith.index_cast %c6_i32 : i32 to index
    %c0_88 = arith.constant 0 : index
    %c0_89 = arith.constant 0 : index
    %240 = vector.load %arg2[%239, %c0_88, %c0_89] : memref<8x8x512xbf16, #tpu.memory_space<vmem>>, vector<1x8x512xbf16>
    %241 = vector.shape_cast %240 : vector<1x8x512xbf16> to vector<8x512xbf16>
    %242 = arith.extf %241 : vector<8x512xbf16> to vector<8x512xf32>
    %243 = arith.truncf %238 : vector<8x128xf32> to vector<8x128xbf16>
    %c0_90 = arith.constant 0 : index
    %c0_91 = arith.constant 0 : index
    %244 = vector.load %arg3[%c0_90, %c0_91] : memref<128x512xbf16, #tpu.memory_space<vmem>>, vector<128x512xbf16>
    %cst_92 = arith.constant dense<0.000000e+00> : vector<8x512xf32>
    %245 = tpu.matmul %243, %244, %cst_92 {dimension_numbers = #tpu.dot_dimension_numbers<[1], [0], [0], [1], [0, 0, 1, 1], [], []>} : vector<8x128xbf16>, vector<128x512xbf16>, vector<8x512xf32> -> vector<8x512xf32>
    %246 = arith.addf %242, %245 : vector<8x512xf32>
    %247 = vector.extract_strided_slice %246 {offsets = [0, 0], sizes = [8, 128], strides = [1, 1]} : vector<8x512xf32> to vector<8x128xf32>
    %cst_93 = arith.constant 5.000000e-01 : f32
    %248 = vector.broadcast %cst_93 : f32 to vector<8x128xf32>
    %249 = arith.mulf %248, %247 : vector<8x128xf32>
    %250 = math.tanh %249 : vector<8x128xf32>
    %cst_94 = arith.constant 5.000000e-01 : f32
    %251 = vector.broadcast %cst_94 : f32 to vector<8x128xf32>
    %252 = arith.mulf %251, %250 : vector<8x128xf32>
    %cst_95 = arith.constant 5.000000e-01 : f32
    %253 = vector.broadcast %cst_95 : f32 to vector<8x128xf32>
    %254 = arith.addf %252, %253 : vector<8x128xf32>
    %255 = vector.extract_strided_slice %246 {offsets = [0, 128], sizes = [8, 128], strides = [1, 1]} : vector<8x512xf32> to vector<8x128xf32>
    %cst_96 = arith.constant 5.000000e-01 : f32
    %256 = vector.broadcast %cst_96 : f32 to vector<8x128xf32>
    %257 = arith.mulf %256, %255 : vector<8x128xf32>
    %258 = math.tanh %257 : vector<8x128xf32>
    %cst_97 = arith.constant 5.000000e-01 : f32
    %259 = vector.broadcast %cst_97 : f32 to vector<8x128xf32>
    %260 = arith.mulf %259, %258 : vector<8x128xf32>
    %cst_98 = arith.constant 5.000000e-01 : f32
    %261 = vector.broadcast %cst_98 : f32 to vector<8x128xf32>
    %262 = arith.addf %260, %261 : vector<8x128xf32>
    %263 = vector.extract_strided_slice %246 {offsets = [0, 256], sizes = [8, 128], strides = [1, 1]} : vector<8x512xf32> to vector<8x128xf32>
    %264 = math.tanh %263 : vector<8x128xf32>
    %265 = vector.extract_strided_slice %246 {offsets = [0, 384], sizes = [8, 128], strides = [1, 1]} : vector<8x512xf32> to vector<8x128xf32>
    %cst_99 = arith.constant 5.000000e-01 : f32
    %266 = vector.broadcast %cst_99 : f32 to vector<8x128xf32>
    %267 = arith.mulf %266, %265 : vector<8x128xf32>
    %268 = math.tanh %267 : vector<8x128xf32>
    %cst_100 = arith.constant 5.000000e-01 : f32
    %269 = vector.broadcast %cst_100 : f32 to vector<8x128xf32>
    %270 = arith.mulf %269, %268 : vector<8x128xf32>
    %cst_101 = arith.constant 5.000000e-01 : f32
    %271 = vector.broadcast %cst_101 : f32 to vector<8x128xf32>
    %272 = arith.addf %270, %271 : vector<8x128xf32>
    %273 = arith.mulf %262, %236 : vector<8x128xf32>
    %274 = arith.mulf %254, %264 : vector<8x128xf32>
    %275 = arith.addf %273, %274 : vector<8x128xf32>
    %276 = math.tanh %275 : vector<8x128xf32>
    %277 = arith.mulf %272, %276 : vector<8x128xf32>
    %c7_i32 = arith.constant 7 : i32
    %278 = arith.index_cast %c7_i32 : i32 to index
    %c0_102 = arith.constant 0 : index
    %c0_103 = arith.constant 0 : index
    %279 = vector.load %arg2[%278, %c0_102, %c0_103] : memref<8x8x512xbf16, #tpu.memory_space<vmem>>, vector<1x8x512xbf16>
    %280 = vector.shape_cast %279 : vector<1x8x512xbf16> to vector<8x512xbf16>
    %281 = arith.extf %280 : vector<8x512xbf16> to vector<8x512xf32>
    %282 = arith.truncf %277 : vector<8x128xf32> to vector<8x128xbf16>
    %c0_104 = arith.constant 0 : index
    %c0_105 = arith.constant 0 : index
    %283 = vector.load %arg3[%c0_104, %c0_105] : memref<128x512xbf16, #tpu.memory_space<vmem>>, vector<128x512xbf16>
    %cst_106 = arith.constant dense<0.000000e+00> : vector<8x512xf32>
    %284 = tpu.matmul %282, %283, %cst_106 {dimension_numbers = #tpu.dot_dimension_numbers<[1], [0], [0], [1], [0, 0, 1, 1], [], []>} : vector<8x128xbf16>, vector<128x512xbf16>, vector<8x512xf32> -> vector<8x512xf32>
    %285 = arith.addf %281, %284 : vector<8x512xf32>
    %286 = vector.extract_strided_slice %285 {offsets = [0, 0], sizes = [8, 128], strides = [1, 1]} : vector<8x512xf32> to vector<8x128xf32>
    %cst_107 = arith.constant 5.000000e-01 : f32
    %287 = vector.broadcast %cst_107 : f32 to vector<8x128xf32>
    %288 = arith.mulf %287, %286 : vector<8x128xf32>
    %289 = math.tanh %288 : vector<8x128xf32>
    %cst_108 = arith.constant 5.000000e-01 : f32
    %290 = vector.broadcast %cst_108 : f32 to vector<8x128xf32>
    %291 = arith.mulf %290, %289 : vector<8x128xf32>
    %cst_109 = arith.constant 5.000000e-01 : f32
    %292 = vector.broadcast %cst_109 : f32 to vector<8x128xf32>
    %293 = arith.addf %291, %292 : vector<8x128xf32>
    %294 = vector.extract_strided_slice %285 {offsets = [0, 128], sizes = [8, 128], strides = [1, 1]} : vector<8x512xf32> to vector<8x128xf32>
    %cst_110 = arith.constant 5.000000e-01 : f32
    %295 = vector.broadcast %cst_110 : f32 to vector<8x128xf32>
    %296 = arith.mulf %295, %294 : vector<8x128xf32>
    %297 = math.tanh %296 : vector<8x128xf32>
    %cst_111 = arith.constant 5.000000e-01 : f32
    %298 = vector.broadcast %cst_111 : f32 to vector<8x128xf32>
    %299 = arith.mulf %298, %297 : vector<8x128xf32>
    %cst_112 = arith.constant 5.000000e-01 : f32
    %300 = vector.broadcast %cst_112 : f32 to vector<8x128xf32>
    %301 = arith.addf %299, %300 : vector<8x128xf32>
    %302 = vector.extract_strided_slice %285 {offsets = [0, 256], sizes = [8, 128], strides = [1, 1]} : vector<8x512xf32> to vector<8x128xf32>
    %303 = math.tanh %302 : vector<8x128xf32>
    %304 = vector.extract_strided_slice %285 {offsets = [0, 384], sizes = [8, 128], strides = [1, 1]} : vector<8x512xf32> to vector<8x128xf32>
    %cst_113 = arith.constant 5.000000e-01 : f32
    %305 = vector.broadcast %cst_113 : f32 to vector<8x128xf32>
    %306 = arith.mulf %305, %304 : vector<8x128xf32>
    %307 = math.tanh %306 : vector<8x128xf32>
    %cst_114 = arith.constant 5.000000e-01 : f32
    %308 = vector.broadcast %cst_114 : f32 to vector<8x128xf32>
    %309 = arith.mulf %308, %307 : vector<8x128xf32>
    %cst_115 = arith.constant 5.000000e-01 : f32
    %310 = vector.broadcast %cst_115 : f32 to vector<8x128xf32>
    %311 = arith.addf %309, %310 : vector<8x128xf32>
    %312 = arith.mulf %301, %275 : vector<8x128xf32>
    %313 = arith.mulf %293, %303 : vector<8x128xf32>
    %314 = arith.addf %312, %313 : vector<8x128xf32>
    %315 = math.tanh %314 : vector<8x128xf32>
    %316 = arith.mulf %311, %315 : vector<8x128xf32>
    %c8_i32 = arith.constant 8 : i32
    %c0_116 = arith.constant 0 : index
    %c0_117 = arith.constant 0 : index
    %317 = vector.load %arg7[%c0_116, %c0_117] : memref<8x128xf32, #tpu.memory_space<vmem>>, vector<8x128xf32>
    tpu.vector_store %arg7[%c0_116, %c0_117], %316 {strides = array<i32>} : memref<8x128xf32, #tpu.memory_space<vmem>>, vector<8x128xf32>,
    %c0_118 = arith.constant 0 : index
    %c0_119 = arith.constant 0 : index
    %318 = vector.load %arg8[%c0_118, %c0_119] : memref<8x128xf32, #tpu.memory_space<vmem>>, vector<8x128xf32>
    tpu.vector_store %arg8[%c0_118, %c0_119], %314 {strides = array<i32>} : memref<8x128xf32, #tpu.memory_space<vmem>>, vector<8x128xf32>,
    %c0_i32_120 = arith.constant 0 : i32
    %319 = arith.cmpi eq, %arg1, %c0_i32_120 : i32
    %320 = arith.extui %319 : i1 to i32
    %c0_i32_121 = arith.constant 0 : i32
    %321 = arith.cmpi ne, %320, %c0_i32_121 : i32
    scf.if %321 {
      %c0_122 = arith.constant 0 : index
      %c0_123 = arith.constant 0 : index
      %322 = vector.load %arg4[%c0_122, %c0_123] : memref<128x128xf32, #tpu.memory_space<vmem>>, vector<128x128xf32>
      %cst_124 = arith.constant dense<0.000000e+00> : vector<8x128xf32>
      %323 = tpu.matmul %316, %322, %cst_124 {dimension_numbers = #tpu.dot_dimension_numbers<[1], [0], [0], [1], [0, 0, 1, 1], [], []>} : vector<8x128xf32>, vector<128x128xf32>, vector<8x128xf32> -> vector<8x128xf32>
      %c0_125 = arith.constant 0 : index
      %c0_126 = arith.constant 0 : index
      %324 = vector.load %arg5[%c0_125, %c0_126] : memref<1x128xf32, #tpu.memory_space<vmem>>, vector<1x128xf32>
      %325 = vector.broadcast %324 : vector<1x128xf32> to vector<8x128xf32>
      %326 = arith.addf %323, %325 : vector<8x128xf32>
      %c0_127 = arith.constant 0 : index
      %c0_128 = arith.constant 0 : index
      %327 = vector.load %arg6[%c0_127, %c0_128] : memref<8x128xf32, #tpu.memory_space<vmem>>, vector<8x128xf32>
      tpu.vector_store %arg6[%c0_127, %c0_128], %326 {strides = array<i32>} : memref<8x128xf32, #tpu.memory_space<vmem>>, vector<8x128xf32>,
    } else {
    }
    return
  }
  func.func @transform_0(%arg0: i32, %arg1: i32) -> (i32, i32, i32) {
    %c0_i32 = arith.constant 0 : i32
    %c0_i32_0 = arith.constant 0 : i32
    return %arg1, %arg0, %c0_i32 : i32, i32, i32
  }
  func.func @transform_1(%arg0: i32, %arg1: i32) -> (i32, i32) {
    %c0_i32 = arith.constant 0 : i32
    %c0_i32_0 = arith.constant 0 : i32
    %c0_i32_1 = arith.constant 0 : i32
    return %c0_i32, %c0_i32_0 : i32, i32
  }
  func.func @transform_2(%arg0: i32, %arg1: i32) -> (i32, i32) {
    %c0_i32 = arith.constant 0 : i32
    %c0_i32_0 = arith.constant 0 : i32
    %c0_i32_1 = arith.constant 0 : i32
    return %c0_i32, %c0_i32_0 : i32, i32
  }
  func.func @transform_3(%arg0: i32, %arg1: i32) -> (i32, i32) {
    %c0_i32 = arith.constant 0 : i32
    %c0_i32_0 = arith.constant 0 : i32
    %c0_i32_1 = arith.constant 0 : i32
    return %c0_i32, %c0_i32_0 : i32, i32
  }
  func.func @transform_4(%arg0: i32, %arg1: i32) -> (i32, i32) {
    %c0_i32 = arith.constant 0 : i32
    %c0_i32_0 = arith.constant 0 : i32
    return %arg0, %c0_i32 : i32, i32
  }
}

</mosaic_0001>

<bundles_post_ra>
// kernel: tpu_custom_call.1
= control target key start
LH: loop header
LB: loop body
LE: loop exit
PB: predicated region body
PF: predicated region fallthrough
CT: control target
= control target key end

     0   :  { %9 = vsyncpa [#allocation5], 0  ;;  %s1729_s0 = inlined_call_operand.hbm [shape: bf16[8,8,512], index: 0, kind: input, shape index: {}]   ;;  %s1730_s1 = inlined_call_operand.hbm [shape: bf16[128,512], index: 1, kind: input, shape index: {}]   ;;  %s1731_s2 = inlined_call_operand.hbm [shape: f32[128,128], index: 2, kind: input, shape index: {}]   ;;  %s1732_s3 = inlined_call_operand.vmem [shape: f32[1,128], index: 3, kind: input, shape index: {}]   ;;  %s1733_s4 = inlined_call_operand.hbm [shape: f32[8,128], index: 4, kind: output, shape index: {}]  }
   0x1   :  { %10 = vsyncpa [#allocation8], 0 }
   0x2   :  { %11 = vsyncpa [#allocation6], 0  ;;  %s29_s17 = sshll.u32 %s1730_s1, 4  ;;  %s1336_s18 = smov [#allocation7]   ;;  %s30_s17 = int_to_ptr.hbm [resolvable:$true] %s29_s17 }
   0x3   :  { %s31_s19 = sshll.u32 %s1336_s18, 4  ;;  %s16_s22 = sshll.u32 %s1729_s0, 4  ;;  %s32_s19 = int_to_ptr.vmem [resolvable:$true] %s31_s19  ;;  %s17_s22 = int_to_ptr.hbm [resolvable:$true] %s16_s22 }
   0x4   :  { %s1337_s23 = smov 256   ;;  %s1338_s24 = smov 16  }
   0x5   :  { %37 = dma.hbm_to_vmem [thread:$0]  %s30_s17, 4096, %s32_s19, [#allocation8], %s1337_s23, %s1337_s23, %s1338_s24  }
   0x6   :  { %s1339_s25 = smov [#allocation4]   ;;  %s42_s29 = sshll.u32 %s1731_s2, 4  ;;  %s43_s29 = int_to_ptr.hbm [resolvable:$true] %s42_s29 }
   0x7   :  { %s18_s26 = sshll.u32 %s1339_s25, 4  ;;  %s1340_s1 = smov [#allocation9]   ;;  %s19_s26 = int_to_ptr.vmem [resolvable:$true] %s18_s26 }
   0x8   :  { %24 = dma.hbm_to_vmem [thread:$0]  %s17_s22, 2048, %s19_s26, [#allocation5], %s1337_s23, %s1337_s23, %s1338_s24  }
   0x9   :  { %s44_s30 = sshll.u32 %s1340_s1, 4  ;;  %s1341_s5 = smov 128   ;;  %s45_s30 = int_to_ptr.vmem [resolvable:$true] %s44_s30 }
   0xa   :  { %s1342_s6 = smov 8  }
   0xb   :  { %50 = dma.hbm_to_vmem [thread:$0]  %s43_s29, 2048, %s45_s30, [#allocation8], %s1341_s5, %s1341_s5, %s1342_s6  }
   0xc   :  { %1330 = dma.done.wait [#allocation5], 2048  }
   0xd   :  { %1331 = vsyncadd [#allocation5], 4294965248 }
   0xe   :  { %1332 = dma.done.wait [#allocation8], 6144  }
   0xf   :  { %1333 = vsyncadd [#allocation8], 4294961152  ;;  %v1098_v0 = vld [vmem:[#allocation7 + $0xe0] sm:$0xf]  ;;  %v1142_v1 = vld [vmem:[#allocation7 + $0xec] sm:$0xf0] }
  0x10   :  { %v1140_v2 = vld [vmem:[#allocation7 + $0xe4] sm:$0xf]  ;;  %v1379_v3 = vor.u32 %v1142_v1, %v1098_v0  ;;  %v1100_v4 = vld [vmem:[#allocation7 + $0xf0] sm:$0xf0]  ;;  %v1106_v5 = vld [vmem:[#allocation7 + $0xe8] sm:$0xf] }
  0x11   :  { %v1143_v6 = vld [vmem:[#allocation7 + $0xf4] sm:$0xf0]  ;;  %v1381_v7 = vor.u32 %v1140_v2, %v1100_v4  ;;  %v1141_v9 = vld [vmem:[#allocation7 + $0xec] sm:$0xf]  ;;  %v1108_v10 = vld [vmem:[#allocation7 + $0xf8] sm:$0xf0] }
  0x12   :  { %v1383_v8 = vor.u32 %v1143_v6, %v1106_v5  ;;  %v1082_v11 = vld [vmem:[#allocation7 + $0xc0] sm:$0xf]  ;;  %272 = vmatpush.bf16.msra.mxu0 %v1379_v3  ;;  %v1386_v12 = vor.u32 %v1141_v9, %v1108_v10  ;;  %v1138_v13 = vld [vmem:[#allocation7 + $0xcc] sm:$0xf0]  ;;  %v1136_v14 = vld [vmem:[#allocation7 + $0xc4] sm:$0xf] }
  0x13   :  { %v1084_v15 = vld [vmem:[#allocation7 + $0xd0] sm:$0xf0]  ;;  %285 = vmatpush.bf16.msra.mxu1 %v1381_v7  ;;  %v1390_v16 = vor.u32 %v1138_v13, %v1082_v11  ;;  %v1090_v18 = vld [vmem:[#allocation7 + $0xc8] sm:$0xf]  ;;  %v1139_v19 = vld [vmem:[#allocation7 + $0xd4] sm:$0xf0] }
  0x14   :  { %298 = vmatpush.bf16.msra.mxu2 %v1383_v8  ;;  %v1392_v17 = vor.u32 %v1136_v14, %v1084_v15  ;;  %v1137_v20 = vld [vmem:[#allocation7 + $0xcc] sm:$0xf]  ;;  %311 = vmatpush.bf16.msra.mxu3 %v1386_v12  ;;  %v1395_v21 = vor.u32 %v1139_v19, %v1090_v18  ;;  %v1092_v22 = vld [vmem:[#allocation7 + $0xd8] sm:$0xf0]  ;;  %v1066_v23 = vld [vmem:[#allocation7 + $0xa0] sm:$0xf] }
  0x15   :  { %v1134_v24 = vld [vmem:[#allocation7 + $0xac] sm:$0xf0]  ;;  %v1397_v25 = vor.u32 %v1137_v20, %v1092_v22  ;;  %v1132_v26 = vld [vmem:[#allocation7 + $0xa4] sm:$0xf]  ;;  %v1068_v27 = vld [vmem:[#allocation7 + $0xb0] sm:$0xf0] }
  0x16   :  { %v1074_v28 = vld [vmem:[#allocation7 + $0xa8] sm:$0xf]  ;;  %273 = vmatpush.bf16.msra.mxu0 %v1390_v16  ;;  %v1400_v29 = vor.u32 %v1134_v24, %v1066_v23  ;;  %v1135_v30 = vld [vmem:[#allocation7 + $0xb4] sm:$0xf0]  ;;  %v1133_v31 = vld [vmem:[#allocation7 + $0xac] sm:$0xf]  ;;  %v1404_v33 = vor.u32 %v1132_v26, %v1068_v27 }
  0x17   :  { %v1076_v32 = vld [vmem:[#allocation7 + $0xb8] sm:$0xf0]  ;;  %286 = vmatpush.bf16.msra.mxu1 %v1392_v17  ;;  %v1406_v34 = vor.u32 %v1135_v30, %v1074_v28  ;;  %v1050_v35 = vld [vmem:[#allocation7 + $0x80] sm:$0xf]  ;;  %v1130_v36 = vld [vmem:[#allocation7 + $0x8c] sm:$0xf0] }
  0x18   :  { %299 = vmatpush.bf16.msra.mxu2 %v1395_v21  ;;  %v1128_v37 = vld [vmem:[#allocation7 + $0x84] sm:$0xf]  ;;  %312 = vmatpush.bf16.msra.mxu3 %v1397_v25  ;;  %v1409_v38 = vor.u32 %v1133_v31, %v1076_v32  ;;  %v1052_v39 = vld [vmem:[#allocation7 + $0x90] sm:$0xf0]  ;;  %v1058_v40 = vld [vmem:[#allocation7 + $0x88] sm:$0xf]  ;;  %v1412_v44 = vor.u32 %v1130_v36, %v1050_v35 }
  0x19   :  { %v1131_v41 = vld [vmem:[#allocation7 + $0x94] sm:$0xf0]  ;;  %v1129_v42 = vld [vmem:[#allocation7 + $0x8c] sm:$0xf]  ;;  %v1060_v43 = vld [vmem:[#allocation7 + $0x98] sm:$0xf0]  ;;  %v1416_v45 = vor.u32 %v1128_v37, %v1052_v39 }
  0x1a   :  { %274 = vmatpush.bf16.msra.mxu0 %v1400_v29  ;;  %v1418_v46 = vor.u32 %v1131_v41, %v1058_v40  ;;  %v1034_v47 = vld [vmem:[#allocation7 + $0x60] sm:$0xf]  ;;  %v1126_v48 = vld [vmem:[#allocation7 + $0x6c] sm:$0xf0]  ;;  %v1124_v49 = vld [vmem:[#allocation7 + $0x64] sm:$0xf]  ;;  %v1421_v50 = vor.u32 %v1129_v42, %v1060_v43 }
  0x1b   :  { %287 = vmatpush.bf16.msra.mxu1 %v1404_v33  ;;  %v1036_v51 = vld [vmem:[#allocation7 + $0x70] sm:$0xf0]  ;;  %v1042_v52 = vld [vmem:[#allocation7 + $0x68] sm:$0xf]  ;;  %v1127_v53 = vld [vmem:[#allocation7 + $0x74] sm:$0xf0]  ;;  %v1424_v56 = vor.u32 %v1126_v48, %v1034_v47 }
  0x1c   :  { %300 = vmatpush.bf16.msra.mxu2 %v1406_v34  ;;  %313 = vmatpush.bf16.msra.mxu3 %v1409_v38  ;;  %v1125_v54 = vld [vmem:[#allocation7 + $0x6c] sm:$0xf]  ;;  %v1044_v55 = vld [vmem:[#allocation7 + $0x78] sm:$0xf0]  ;;  %v1428_v57 = vor.u32 %v1124_v49, %v1036_v51  ;;  %v1430_v58 = vor.u32 %v1127_v53, %v1042_v52  ;;  %v1018_v59 = vld [vmem:[#allocation7 + $0x40] sm:$0xf] }
  0x1d   :  { %v1122_v60 = vld [vmem:[#allocation7 + $0x4c] sm:$0xf0]  ;;  %v1120_v61 = vld [vmem:[#allocation7 + $0x44] sm:$0xf]  ;;  %v1433_v62 = vor.u32 %v1125_v54, %v1044_v55  ;;  %v1020_v63 = vld [vmem:[#allocation7 + $0x50] sm:$0xf0] }
  0x1e   :  { %275 = vmatpush.bf16.msra.mxu0 %v1412_v44  ;;  %v1026_v0 = vld [vmem:[#allocation7 + $0x48] sm:$0xf]  ;;  %v1123_v1 = vld [vmem:[#allocation7 + $0x54] sm:$0xf0]  ;;  %v1121_v2 = vld [vmem:[#allocation7 + $0x4c] sm:$0xf]  ;;  %v1436_v5 = vor.u32 %v1122_v60, %v1018_v59  ;;  %v1440_v9 = vor.u32 %v1120_v61, %v1020_v63 }
  0x1f   :  { %288 = vmatpush.bf16.msra.mxu1 %v1416_v45  ;;  %v1028_v4 = vld [vmem:[#allocation7 + $0x58] sm:$0xf0]  ;;  %v1002_v6 = vld [vmem:[#allocation7 + $0x20] sm:$0xf]  ;;  %v1442_v10 = vor.u32 %v1123_v1, %v1026_v0  ;;  %v1118_v11 = vld [vmem:[#allocation7 + $0x2c] sm:$0xf0] }
  0x20   :  { %301 = vmatpush.bf16.msra.mxu2 %v1418_v46  ;;  %314 = vmatpush.bf16.msra.mxu3 %v1421_v50  ;;  %v1116_v13 = vld [vmem:[#allocation7 + $0x24] sm:$0xf]  ;;  %v1004_v14 = vld [vmem:[#allocation7 + $0x30] sm:$0xf0]  ;;  %v1445_v15 = vor.u32 %v1121_v2, %v1028_v4  ;;  %v1010_v18 = vld [vmem:[#allocation7 + $0x28] sm:$0xf]  ;;  %v1448_v23 = vor.u32 %v1118_v11, %v1002_v6 }
  0x21   :  { %v1119_v19 = vld [vmem:[#allocation7 + $0x34] sm:$0xf0]  ;;  %v1117_v20 = vld [vmem:[#allocation7 + $0x2c] sm:$0xf]  ;;  %v1012_v22 = vld [vmem:[#allocation7 + $0x38] sm:$0xf0]  ;;  %v1452_v24 = vor.u32 %v1116_v13, %v1004_v14 }
  0x22   :  { %276 = vmatpush.bf16.msra.mxu0 %v1424_v56  ;;  %v1454_v26 = vor.u32 %v1119_v19, %v1010_v18  ;;  %v986_v27 = vld [vmem:[#allocation7] sm:$0xf]  ;;  %v1114_v28 = vld [vmem:[#allocation7 + $0xc] sm:$0xf0]  ;;  %v1112_v30 = vld [vmem:[#allocation7 + $0x4] sm:$0xf]  ;;  %v1457_v31 = vor.u32 %v1117_v20, %v1012_v22 }
  0x23   :  { %289 = vmatpush.bf16.msra.mxu1 %v1428_v57  ;;  %v988_v32 = vld [vmem:[#allocation7 + $0x10] sm:$0xf0]  ;;  %v994_v35 = vld [vmem:[#allocation7 + $0x8] sm:$0xf]  ;;  %v1115_v36 = vld [vmem:[#allocation7 + $0x14] sm:$0xf0]  ;;  %v1460_v40 = vor.u32 %v1114_v28, %v986_v27 }
  0x24   :  { %302 = vmatpush.bf16.msra.mxu2 %v1430_v58  ;;  %315 = vmatpush.bf16.msra.mxu3 %v1433_v62  ;;  %v1113_v37 = vld [vmem:[#allocation7 + $0xc] sm:$0xf]  ;;  %v996_v39 = vld [vmem:[#allocation7 + $0x18] sm:$0xf0]  ;;  %v1464_v41 = vor.u32 %v1112_v30, %v988_v32  ;;  %v1466_v42 = vor.u32 %v1115_v36, %v994_v35  ;;  %v1343_v47 = vmov 0.0|0.0   ;;  %v73_v48 = vld [vmem:[#allocation4] sm:$0xff] }
  0x25   :  { %v1469_v43 = vor.u32 %v1113_v37, %v996_v39  ;;  %v75_v49 = vunpack.c.l.bf16 %v73_v48  ;;  %v76_v51 = vunpack.c.h.bf16 %v73_v48  ;;  %v74_v55 = vld [vmem:[#allocation4 + $0x8] sm:$0xff]  ;;  %s1344_s7 = smov [#allocation10]   ;;  %s973_s11 = sshll.u32 %s1733_s4, 4  ;;  %s974_s11 = int_to_ptr.hbm [resolvable:$true] %s973_s11 }
  0x26   :  { %277 = vmatpush.bf16.msra.mxu0 %v1436_v5  ;;  %v77_v63 = vunpack.c.l.bf16 %v74_v55  ;;  %v78_v0 = vunpack.c.h.bf16 %v74_v55  ;;  %s971_s8 = sshll.u32 %s1344_s7, 4  ;;  %s972_s8 = int_to_ptr.vmem [resolvable:$true] %s971_s8 }
  0x27   :  { %290 = vmatpush.bf16.msra.mxu1 %v1440_v9 }
  0x28   :  { %303 = vmatpush.bf16.msra.mxu2 %v1442_v10  ;;  %316 = vmatpush.bf16.msra.mxu3 %v1445_v15 }
  0x2a   :  { %278 = vmatpush.bf16.msra.mxu0 %v1448_v23 }
  0x2b   :  { %291 = vmatpush.bf16.msra.mxu1 %v1452_v24 }
  0x2c   :  { %304 = vmatpush.bf16.msra.mxu2 %v1454_v26  ;;  %317 = vmatpush.bf16.msra.mxu3 %v1457_v31 }
  0x2e   :  { %279 = vmatpush.bf16.msra.mxu0 %v1460_v40 }
  0x2f   :  { %292 = vmatpush.bf16.msra.mxu1 %v1464_v41 }
  0x30   :  { %305 = vmatpush.bf16.msra.mxu2 %v1466_v42  ;;  %318 = vmatpush.bf16.msra.mxu3 %v1469_v43 }
  0x31   :  { %280 = vmatmul.bf16.vlgmr.msra.gmra.mxu0 %v1343_v47 }
  0x32   :  { %354 = vmatpush.bf16.msrb.mxu0 %v1379_v3  ;;  %293 = vmatmul.bf16.vlgmr.msra.gmra.mxu1 %v1343_v47 }
  0x33   :  { %367 = vmatpush.bf16.msrb.mxu1 %v1381_v7  ;;  %306 = vmatmul.bf16.vlgmr.msra.gmra.mxu2 %v1343_v47 }
  0x34   :  { %319 = vmatmul.bf16.vlgmr.msra.gmra.mxu3 %v1343_v47  ;;  %380 = vmatpush.bf16.msrb.mxu2 %v1383_v8 }
  0x35   :  { %393 = vmatpush.bf16.msrb.mxu3 %v1386_v12 }
  0x36   :  { %355 = vmatpush.bf16.msrb.mxu0 %v1390_v16 }
  0x37   :  { %368 = vmatpush.bf16.msrb.mxu1 %v1392_v17 }
  0x38   :  { %381 = vmatpush.bf16.msrb.mxu2 %v1395_v21 }
  0x39   :  { %394 = vmatpush.bf16.msrb.mxu3 %v1397_v25 }
  0x3a   :  { %356 = vmatpush.bf16.msrb.mxu0 %v1400_v29 }
  0x3b   :  { %369 = vmatpush.bf16.msrb.mxu1 %v1404_v33 }
  0x3c   :  { %382 = vmatpush.bf16.msrb.mxu2 %v1406_v34 }
  0x3d   :  { %395 = vmatpush.bf16.msrb.mxu3 %v1409_v38 }
  0x3e   :  { %357 = vmatpush.bf16.msrb.mxu0 %v1412_v44 }
  0x3f   :  { %370 = vmatpush.bf16.msrb.mxu1 %v1416_v45 }
  0x40   :  { %383 = vmatpush.bf16.msrb.mxu2 %v1418_v46 }
  0x41   :  { %396 = vmatpush.bf16.msrb.mxu3 %v1421_v50 }
  0x42   :  { %358 = vmatpush.bf16.msrb.mxu0 %v1424_v56 }
  0x43   :  { %371 = vmatpush.bf16.msrb.mxu1 %v1428_v57 }
  0x44   :  { %384 = vmatpush.bf16.msrb.mxu2 %v1430_v58 }
  0x45   :  { %397 = vmatpush.bf16.msrb.mxu3 %v1433_v62 }
  0x46   :  { %359 = vmatpush.bf16.msrb.mxu0 %v1436_v5 }
  0x47   :  { %372 = vmatpush.bf16.msrb.mxu1 %v1440_v9 }
  0x48   :  { %385 = vmatpush.bf16.msrb.mxu2 %v1442_v10 }
  0x49   :  { %398 = vmatpush.bf16.msrb.mxu3 %v1445_v15 }
  0x4a   :  { %360 = vmatpush.bf16.msrb.mxu0 %v1448_v23 }
  0x4b   :  { %373 = vmatpush.bf16.msrb.mxu1 %v1452_v24 }
  0x4c   :  { %386 = vmatpush.bf16.msrb.mxu2 %v1454_v26 }
  0x4d   :  { %399 = vmatpush.bf16.msrb.mxu3 %v1457_v31 }
  0x4e   :  { %361 = vmatpush.bf16.msrb.mxu0 %v1460_v40 }
  0x4f   :  { %374 = vmatpush.bf16.msrb.mxu1 %v1464_v41 }
  0x50   :  { %387 = vmatpush.bf16.msrb.mxu2 %v1466_v42 }
  0x51   :  { %400 = vmatpush.bf16.msrb.mxu3 %v1469_v43 }
  0x52   :  { %436 = vmatpush.bf16.msra.mxu0 %v1379_v3 }
  0x53   :  { %449 = vmatpush.bf16.msra.mxu1 %v1381_v7 }
  0x54   :  { %462 = vmatpush.bf16.msra.mxu2 %v1383_v8 }
  0x55   :  { %475 = vmatpush.bf16.msra.mxu3 %v1386_v12 }
  0x56   :  { %437 = vmatpush.bf16.msra.mxu0 %v1390_v16 }
  0x57   :  { %450 = vmatpush.bf16.msra.mxu1 %v1392_v17 }
  0x58   :  { %463 = vmatpush.bf16.msra.mxu2 %v1395_v21 }
  0x59   :  { %476 = vmatpush.bf16.msra.mxu3 %v1397_v25 }
  0x5a   :  { %438 = vmatpush.bf16.msra.mxu0 %v1400_v29 }
  0x5b   :  { %451 = vmatpush.bf16.msra.mxu1 %v1404_v33 }
  0x5c   :  { %464 = vmatpush.bf16.msra.mxu2 %v1406_v34 }
  0x5d   :  { %477 = vmatpush.bf16.msra.mxu3 %v1409_v38 }
  0x5e   :  { %439 = vmatpush.bf16.msra.mxu0 %v1412_v44 }
  0x5f   :  { %452 = vmatpush.bf16.msra.mxu1 %v1416_v45 }
  0x60   :  { %465 = vmatpush.bf16.msra.mxu2 %v1418_v46 }
  0x61   :  { %478 = vmatpush.bf16.msra.mxu3 %v1421_v50 }
  0x62   :  { %440 = vmatpush.bf16.msra.mxu0 %v1424_v56 }
  0x63   :  { %453 = vmatpush.bf16.msra.mxu1 %v1428_v57 }
  0x64   :  { %466 = vmatpush.bf16.msra.mxu2 %v1430_v58 }
  0x65   :  { %479 = vmatpush.bf16.msra.mxu3 %v1433_v62 }
  0x66   :  { %441 = vmatpush.bf16.msra.mxu0 %v1436_v5 }
  0x67   :  { %454 = vmatpush.bf16.msra.mxu1 %v1440_v9 }
  0x68   :  { %467 = vmatpush.bf16.msra.mxu2 %v1442_v10 }
  0x69   :  { %480 = vmatpush.bf16.msra.mxu3 %v1445_v15 }
  0x6a   :  { %442 = vmatpush.bf16.msra.mxu0 %v1448_v23 }
  0x6b   :  { %455 = vmatpush.bf16.msra.mxu1 %v1452_v24 }
  0x6c   :  { %468 = vmatpush.bf16.msra.mxu2 %v1454_v26 }
  0x6d   :  { %481 = vmatpush.bf16.msra.mxu3 %v1457_v31 }
  0x6e   :  { %443 = vmatpush.bf16.msra.mxu0 %v1460_v40 }
  0x6f   :  { %456 = vmatpush.bf16.msra.mxu1 %v1464_v41 }
  0x70   :  { %469 = vmatpush.bf16.msra.mxu2 %v1466_v42 }
  0x71   :  { %482 = vmatpush.bf16.msra.mxu3 %v1469_v43 }
  0xae   :  { %v281_v52 = vpop.f32.mrf.mxu0 }
  0xaf   :  { %v324_v53 = vadd.f32 %v281_v52, %v75_v49  ;;  %v294_v54 = vpop.f32.mrf.mxu1 }
  0xb0   :  { %v325_v59 = vadd.f32 %v294_v54, %v76_v51  ;;  %v347_v54 = vld [vmem:[#allocation4 + $0x10] sm:$0xff] }
  0xb1   :  { %v328_v60 = vmul.f32 0.5, %v324_v53  ;;  %v349_v55 = vunpack.c.l.bf16 %v347_v54 }
  0xb2   :  { %v332_v61 = vmul.f32 0.5, %v325_v59  ;;  %v350_v59 = vunpack.c.h.bf16 %v347_v54 }
  0xb3   :  { %1154 = vtanh.f32 %v328_v60 }
  0xb4   :  { %1156 = vtanh.f32 %v332_v61 }
  0xb6   :  { %v307_v1 = vpop.f32.mrf.mxu2  ;;  %v283_v6 = vpop.f32.mrf.mxu0 }
  0xb7   :  { %v326_v2 = vadd.f32 %v307_v1, %v77_v63  ;;  %v320_v4 = vpop.f32.mrf.mxu3  ;;  %v296_v13 = vpop.f32.mrf.mxu1  ;;  %v348_v1 = vld [vmem:[#allocation4 + $0x18] sm:$0xff] }
  0xb8   :  { %v327_v11 = vadd.f32 %v320_v4, %v78_v0  ;;  %v351_v6 = vunpack.c.l.bf16 %v348_v1 }
  0xb9   :  { %1158 = vtanh.f32 %v326_v2  ;;  %v1155_v14 = vpop.eup %1154 }
  0xba   :  { %v337_v18 = vmul.f32 0.5, %v327_v11  ;;  %v1157_v19 = vpop.eup %1156  ;;  %v330_v20 = vmul.f32 0.5, %v1155_v14  ;;  %v352_v11 = vunpack.c.h.bf16 %v348_v1 }
  0xbb   :  { %v334_v22 = vmul.f32 0.5, %v1157_v19 }
  0xbc   :  { %1160 = vtanh.f32 %v337_v18  ;;  %v331_v27 = vadd.f32 0.5, %v330_v20 }
  0xbd   :  { %v335_v28 = vadd.f32 0.5, %v334_v22 }
  0xbe   :  { %v309_v30 = vpop.f32.mrf.mxu2 }
  0xbf   :  { %v1159_v32 = vpop.eup %1158  ;;  %v322_v35 = vpop.f32.mrf.mxu3  ;;  %v341_v36 = vmul.f32 0.0, %v335_v28 }
  0xc0   :  { %v342_v37 = vmul.f32 %v1159_v32, %v331_v27 }
  0xc2   :  { %v1161_v39 = vpop.eup %1160  ;;  %v1539_v47 = vadd.f32 %v342_v37, %v341_v36 }
  0xc3   :  { %v339_v48 = vmul.f32 0.5, %v1161_v39 }
  0xc4   :  { %1162 = vtanh.f32 %v1539_v47 }
  0xc5   :  { %v340_v49 = vadd.f32 0.5, %v339_v48 }
  0xca   :  { %v1163_v51 = vpop.eup %1162 }
  0xcb   :  { %v345_v52 = vmul.f32 %v1163_v51, %v340_v49 }
  0xcd   :  { %v353_v53 = vpack.c.bf16 %v345_v52, %v345_v52 }
  0xcf   :  { %362 = vmatmul.bf16.vlgmr.msrb.gmra.mxu0 %v353_v53  ;;  %375 = vmatmul.bf16.vlgmr.msrb.gmra.mxu1 %v353_v53 }
  0xd0   :  { %388 = vmatmul.bf16.vlgmr.msrb.gmra.mxu2 %v353_v53  ;;  %401 = vmatmul.bf16.vlgmr.msrb.gmra.mxu3 %v353_v53 }
  0xd1   :  { %518 = vmatpush.bf16.msrb.mxu0 %v1379_v3  ;;  %531 = vmatpush.bf16.msrb.mxu1 %v1381_v7 }
  0xd2   :  { %544 = vmatpush.bf16.msrb.mxu2 %v1383_v8  ;;  %557 = vmatpush.bf16.msrb.mxu3 %v1386_v12 }
  0xd5   :  { %519 = vmatpush.bf16.msrb.mxu0 %v1390_v16  ;;  %532 = vmatpush.bf16.msrb.mxu1 %v1392_v17 }
  0xd6   :  { %545 = vmatpush.bf16.msrb.mxu2 %v1395_v21  ;;  %558 = vmatpush.bf16.msrb.mxu3 %v1397_v25 }
  0xd9   :  { %520 = vmatpush.bf16.msrb.mxu0 %v1400_v29  ;;  %533 = vmatpush.bf16.msrb.mxu1 %v1404_v33 }
  0xda   :  { %546 = vmatpush.bf16.msrb.mxu2 %v1406_v34  ;;  %559 = vmatpush.bf16.msrb.mxu3 %v1409_v38 }
  0xdd   :  { %521 = vmatpush.bf16.msrb.mxu0 %v1412_v44  ;;  %534 = vmatpush.bf16.msrb.mxu1 %v1416_v45 }
  0xde   :  { %547 = vmatpush.bf16.msrb.mxu2 %v1418_v46  ;;  %560 = vmatpush.bf16.msrb.mxu3 %v1421_v50 }
  0xe1   :  { %522 = vmatpush.bf16.msrb.mxu0 %v1424_v56  ;;  %535 = vmatpush.bf16.msrb.mxu1 %v1428_v57 }
  0xe2   :  { %548 = vmatpush.bf16.msrb.mxu2 %v1430_v58  ;;  %561 = vmatpush.bf16.msrb.mxu3 %v1433_v62 }
  0xe5   :  { %523 = vmatpush.bf16.msrb.mxu0 %v1436_v5  ;;  %536 = vmatpush.bf16.msrb.mxu1 %v1440_v9 }
  0xe6   :  { %549 = vmatpush.bf16.msrb.mxu2 %v1442_v10  ;;  %562 = vmatpush.bf16.msrb.mxu3 %v1445_v15 }
  0xe9   :  { %524 = vmatpush.bf16.msrb.mxu0 %v1448_v23  ;;  %537 = vmatpush.bf16.msrb.mxu1 %v1452_v24 }
  0xea   :  { %550 = vmatpush.bf16.msrb.mxu2 %v1454_v26  ;;  %563 = vmatpush.bf16.msrb.mxu3 %v1457_v31 }
  0xed   :  { %525 = vmatpush.bf16.msrb.mxu0 %v1460_v40  ;;  %538 = vmatpush.bf16.msrb.mxu1 %v1464_v41 }
  0xee   :  { %551 = vmatpush.bf16.msrb.mxu2 %v1466_v42  ;;  %564 = vmatpush.bf16.msrb.mxu3 %v1469_v43 }
 0x14c   :  { %v363_v60 = vpop.f32.mrf.mxu0  ;;  %v376_v61 = vpop.f32.mrf.mxu1 }
 0x14d   :  { %v406_v63 = vadd.f32 %v363_v60, %v349_v55  ;;  %v407_v0 = vadd.f32 %v376_v61, %v350_v59 }
 0x14f   :  { %v410_v2 = vmul.f32 0.5, %v406_v63  ;;  %v414_v4 = vmul.f32 0.5, %v407_v0 }
 0x151   :  { %1164 = vtanh.f32 %v410_v2 }
 0x152   :  { %1166 = vtanh.f32 %v414_v4 }
 0x153   :  { %v389_v13 = vpop.f32.mrf.mxu2  ;;  %v402_v14 = vpop.f32.mrf.mxu3 }
 0x154   :  { %v408_v18 = vadd.f32 %v389_v13, %v351_v6  ;;  %v409_v19 = vadd.f32 %v402_v14, %v352_v11  ;;  %v365_v20 = vpop.f32.mrf.mxu0  ;;  %v378_v22 = vpop.f32.mrf.mxu1  ;;  %v430_v13 = vld [vmem:[#allocation4 + $0x28] sm:$0xff] }
 0x155   :  { %v434_v20 = vunpack.c.h.bf16 %v430_v13 }
 0x156   :  { %1168 = vtanh.f32 %v408_v18  ;;  %v419_v27 = vmul.f32 0.5, %v409_v19  ;;  %v433_v19 = vunpack.c.l.bf16 %v430_v13 }
 0x157   :  { %v1165_v28 = vpop.eup %1164 }
 0x158   :  { %v1167_v30 = vpop.eup %1166  ;;  %v412_v32 = vmul.f32 0.5, %v1165_v28  ;;  %1170 = vtanh.f32 %v419_v27 }
 0x159   :  { %v416_v35 = vmul.f32 0.5, %v1167_v30 }
 0x15a   :  { %v413_v36 = vadd.f32 0.5, %v412_v32 }
 0x15b   :  { %v417_v37 = vadd.f32 0.5, %v416_v35  ;;  %v391_v39 = vpop.f32.mrf.mxu2  ;;  %v404_v48 = vpop.f32.mrf.mxu3 }
 0x15c   :  { %v1169_v49 = vpop.eup %1168 }
 0x15d   :  { %v423_v51 = vmul.f32 %v417_v37, %v1539_v47  ;;  %v424_v52 = vmul.f32 %v1169_v49, %v413_v36  ;;  %v429_v47 = vld [vmem:[#allocation4 + $0x20] sm:$0xff] }
 0x15e   :  { %v1171_v53 = vpop.eup %1170  ;;  %v431_v0 = vunpack.c.l.bf16 %v429_v47  ;;  %v432_v1 = vunpack.c.h.bf16 %v429_v47 }
 0x15f   :  { %v1575_v54 = vadd.f32 %v424_v52, %v423_v51  ;;  %v421_v55 = vmul.f32 0.5, %v1171_v53 }
 0x161   :  { %1172 = vtanh.f32 %v1575_v54  ;;  %v422_v59 = vadd.f32 0.5, %v421_v55 }
 0x167   :  { %v1173_v60 = vpop.eup %1172 }
 0x168   :  { %v427_v61 = vmul.f32 %v1173_v60, %v422_v59 }
 0x16a   :  { %v435_v63 = vpack.c.bf16 %v427_v61, %v427_v61 }
 0x16c   :  { %444 = vmatmul.bf16.vlgmr.msra.gmra.mxu0 %v435_v63  ;;  %457 = vmatmul.bf16.vlgmr.msra.gmra.mxu1 %v435_v63 }
 0x16d   :  { %470 = vmatmul.bf16.vlgmr.msra.gmra.mxu2 %v435_v63  ;;  %483 = vmatmul.bf16.vlgmr.msra.gmra.mxu3 %v435_v63 }
 0x16e   :  { %600 = vmatpush.bf16.msra.mxu0 %v1379_v3  ;;  %613 = vmatpush.bf16.msra.mxu1 %v1381_v7 }
 0x16f   :  { %626 = vmatpush.bf16.msra.mxu2 %v1383_v8  ;;  %639 = vmatpush.bf16.msra.mxu3 %v1386_v12 }
 0x172   :  { %601 = vmatpush.bf16.msra.mxu0 %v1390_v16  ;;  %614 = vmatpush.bf16.msra.mxu1 %v1392_v17 }
 0x173   :  { %627 = vmatpush.bf16.msra.mxu2 %v1395_v21  ;;  %640 = vmatpush.bf16.msra.mxu3 %v1397_v25 }
 0x176   :  { %602 = vmatpush.bf16.msra.mxu0 %v1400_v29  ;;  %615 = vmatpush.bf16.msra.mxu1 %v1404_v33 }
 0x177   :  { %628 = vmatpush.bf16.msra.mxu2 %v1406_v34  ;;  %641 = vmatpush.bf16.msra.mxu3 %v1409_v38 }
 0x17a   :  { %603 = vmatpush.bf16.msra.mxu0 %v1412_v44  ;;  %616 = vmatpush.bf16.msra.mxu1 %v1416_v45 }
 0x17b   :  { %629 = vmatpush.bf16.msra.mxu2 %v1418_v46  ;;  %642 = vmatpush.bf16.msra.mxu3 %v1421_v50 }
 0x17e   :  { %604 = vmatpush.bf16.msra.mxu0 %v1424_v56  ;;  %617 = vmatpush.bf16.msra.mxu1 %v1428_v57 }
 0x17f   :  { %630 = vmatpush.bf16.msra.mxu2 %v1430_v58  ;;  %643 = vmatpush.bf16.msra.mxu3 %v1433_v62 }
 0x182   :  { %605 = vmatpush.bf16.msra.mxu0 %v1436_v5  ;;  %618 = vmatpush.bf16.msra.mxu1 %v1440_v9 }
 0x183   :  { %631 = vmatpush.bf16.msra.mxu2 %v1442_v10  ;;  %644 = vmatpush.bf16.msra.mxu3 %v1445_v15 }
 0x186   :  { %606 = vmatpush.bf16.msra.mxu0 %v1448_v23  ;;  %619 = vmatpush.bf16.msra.mxu1 %v1452_v24 }
 0x187   :  { %632 = vmatpush.bf16.msra.mxu2 %v1454_v26  ;;  %645 = vmatpush.bf16.msra.mxu3 %v1457_v31 }
 0x18a   :  { %607 = vmatpush.bf16.msra.mxu0 %v1460_v40  ;;  %620 = vmatpush.bf16.msra.mxu1 %v1464_v41 }
 0x18b   :  { %633 = vmatpush.bf16.msra.mxu2 %v1466_v42  ;;  %646 = vmatpush.bf16.msra.mxu3 %v1469_v43 }
 0x1e9   :  { %v445_v2 = vpop.f32.mrf.mxu0  ;;  %v458_v4 = vpop.f32.mrf.mxu1 }
 0x1ea   :  { %v488_v6 = vadd.f32 %v445_v2, %v431_v0  ;;  %v489_v11 = vadd.f32 %v458_v4, %v432_v1 }
 0x1ec   :  { %v492_v14 = vmul.f32 0.5, %v488_v6  ;;  %v496_v18 = vmul.f32 0.5, %v489_v11 }
 0x1ee   :  { %1174 = vtanh.f32 %v492_v14 }
 0x1ef   :  { %1176 = vtanh.f32 %v496_v18 }
 0x1f0   :  { %v471_v22 = vpop.f32.mrf.mxu2  ;;  %v484_v27 = vpop.f32.mrf.mxu3 }
 0x1f1   :  { %v490_v28 = vadd.f32 %v471_v22, %v433_v19  ;;  %v491_v30 = vadd.f32 %v484_v27, %v434_v20  ;;  %v447_v32 = vpop.f32.mrf.mxu0  ;;  %v460_v35 = vpop.f32.mrf.mxu1  ;;  %v512_v22 = vld [vmem:[#allocation4 + $0x38] sm:$0xff] }
 0x1f2   :  { %v516_v32 = vunpack.c.h.bf16 %v512_v22 }
 0x1f3   :  { %1178 = vtanh.f32 %v490_v28  ;;  %v501_v36 = vmul.f32 0.5, %v491_v30  ;;  %v515_v30 = vunpack.c.l.bf16 %v512_v22 }
 0x1f4   :  { %v1175_v37 = vpop.eup %1174 }
 0x1f5   :  { %v1177_v39 = vpop.eup %1176  ;;  %v494_v48 = vmul.f32 0.5, %v1175_v37  ;;  %1180 = vtanh.f32 %v501_v36 }
 0x1f6   :  { %v498_v49 = vmul.f32 0.5, %v1177_v39 }
 0x1f7   :  { %v495_v51 = vadd.f32 0.5, %v494_v48 }
 0x1f8   :  { %v499_v52 = vadd.f32 0.5, %v498_v49  ;;  %v473_v53 = vpop.f32.mrf.mxu2  ;;  %v486_v55 = vpop.f32.mrf.mxu3 }
 0x1f9   :  { %v1179_v59 = vpop.eup %1178 }
 0x1fa   :  { %v505_v60 = vmul.f32 %v499_v52, %v1575_v54  ;;  %v506_v61 = vmul.f32 %v1179_v59, %v495_v51  ;;  %v511_v54 = vld [vmem:[#allocation4 + $0x30] sm:$0xff] }
 0x1fb   :  { %v1181_v63 = vpop.eup %1180  ;;  %v513_v11 = vunpack.c.l.bf16 %v511_v54  ;;  %v514_v13 = vunpack.c.h.bf16 %v511_v54 }
 0x1fc   :  { %v1611_v47 = vadd.f32 %v506_v61, %v505_v60  ;;  %v503_v0 = vmul.f32 0.5, %v1181_v63 }
 0x1fe   :  { %1182 = vtanh.f32 %v1611_v47  ;;  %v504_v1 = vadd.f32 0.5, %v503_v0 }
 0x204   :  { %v1183_v2 = vpop.eup %1182 }
 0x205   :  { %v509_v4 = vmul.f32 %v1183_v2, %v504_v1 }
 0x207   :  { %v517_v6 = vpack.c.bf16 %v509_v4, %v509_v4 }
 0x209   :  { %526 = vmatmul.bf16.vlgmr.msrb.gmra.mxu0 %v517_v6  ;;  %539 = vmatmul.bf16.vlgmr.msrb.gmra.mxu1 %v517_v6 }
 0x20a   :  { %552 = vmatmul.bf16.vlgmr.msrb.gmra.mxu2 %v517_v6  ;;  %565 = vmatmul.bf16.vlgmr.msrb.gmra.mxu3 %v517_v6 }
 0x20b   :  { %682 = vmatpush.bf16.msrb.mxu0 %v1379_v3  ;;  %695 = vmatpush.bf16.msrb.mxu1 %v1381_v7 }
 0x20c   :  { %708 = vmatpush.bf16.msrb.mxu2 %v1383_v8  ;;  %721 = vmatpush.bf16.msrb.mxu3 %v1386_v12 }
 0x20f   :  { %683 = vmatpush.bf16.msrb.mxu0 %v1390_v16  ;;  %696 = vmatpush.bf16.msrb.mxu1 %v1392_v17 }
 0x210   :  { %709 = vmatpush.bf16.msrb.mxu2 %v1395_v21  ;;  %722 = vmatpush.bf16.msrb.mxu3 %v1397_v25 }
 0x213   :  { %684 = vmatpush.bf16.msrb.mxu0 %v1400_v29  ;;  %697 = vmatpush.bf16.msrb.mxu1 %v1404_v33 }
 0x214   :  { %710 = vmatpush.bf16.msrb.mxu2 %v1406_v34  ;;  %723 = vmatpush.bf16.msrb.mxu3 %v1409_v38 }
 0x217   :  { %685 = vmatpush.bf16.msrb.mxu0 %v1412_v44  ;;  %698 = vmatpush.bf16.msrb.mxu1 %v1416_v45 }
 0x218   :  { %711 = vmatpush.bf16.msrb.mxu2 %v1418_v46  ;;  %724 = vmatpush.bf16.msrb.mxu3 %v1421_v50 }
 0x21b   :  { %686 = vmatpush.bf16.msrb.mxu0 %v1424_v56  ;;  %699 = vmatpush.bf16.msrb.mxu1 %v1428_v57 }
 0x21c   :  { %712 = vmatpush.bf16.msrb.mxu2 %v1430_v58  ;;  %725 = vmatpush.bf16.msrb.mxu3 %v1433_v62 }
 0x21f   :  { %687 = vmatpush.bf16.msrb.mxu0 %v1436_v5  ;;  %700 = vmatpush.bf16.msrb.mxu1 %v1440_v9 }
 0x220   :  { %713 = vmatpush.bf16.msrb.mxu2 %v1442_v10  ;;  %726 = vmatpush.bf16.msrb.mxu3 %v1445_v15 }
 0x223   :  { %688 = vmatpush.bf16.msrb.mxu0 %v1448_v23  ;;  %701 = vmatpush.bf16.msrb.mxu1 %v1452_v24 }
 0x224   :  { %714 = vmatpush.bf16.msrb.mxu2 %v1454_v26  ;;  %727 = vmatpush.bf16.msrb.mxu3 %v1457_v31 }
 0x227   :  { %689 = vmatpush.bf16.msrb.mxu0 %v1460_v40  ;;  %702 = vmatpush.bf16.msrb.mxu1 %v1464_v41 }
 0x228   :  { %715 = vmatpush.bf16.msrb.mxu2 %v1466_v42  ;;  %728 = vmatpush.bf16.msrb.mxu3 %v1469_v43 }
 0x286   :  { %v527_v14 = vpop.f32.mrf.mxu0  ;;  %v540_v18 = vpop.f32.mrf.mxu1 }
 0x287   :  { %v570_v19 = vadd.f32 %v527_v14, %v513_v11  ;;  %v571_v20 = vadd.f32 %v540_v18, %v514_v13 }
 0x289   :  { %v574_v27 = vmul.f32 0.5, %v570_v19  ;;  %v578_v28 = vmul.f32 0.5, %v571_v20 }
 0x28b   :  { %1184 = vtanh.f32 %v574_v27 }
 0x28c   :  { %1186 = vtanh.f32 %v578_v28 }
 0x28d   :  { %v553_v35 = vpop.f32.mrf.mxu2  ;;  %v566_v36 = vpop.f32.mrf.mxu3 }
 0x28e   :  { %v572_v37 = vadd.f32 %v553_v35, %v515_v30  ;;  %v573_v39 = vadd.f32 %v566_v36, %v516_v32  ;;  %v529_v48 = vpop.f32.mrf.mxu0  ;;  %v542_v49 = vpop.f32.mrf.mxu1  ;;  %v594_v35 = vld [vmem:[#allocation4 + $0x48] sm:$0xff] }
 0x28f   :  { %v598_v48 = vunpack.c.h.bf16 %v594_v35 }
 0x290   :  { %1188 = vtanh.f32 %v572_v37  ;;  %v583_v51 = vmul.f32 0.5, %v573_v39  ;;  %v597_v39 = vunpack.c.l.bf16 %v594_v35 }
 0x291   :  { %v1185_v52 = vpop.eup %1184 }
 0x292   :  { %v1187_v53 = vpop.eup %1186  ;;  %v576_v55 = vmul.f32 0.5, %v1185_v52  ;;  %1190 = vtanh.f32 %v583_v51 }
 0x293   :  { %v580_v59 = vmul.f32 0.5, %v1187_v53 }
 0x294   :  { %v577_v60 = vadd.f32 0.5, %v576_v55 }
 0x295   :  { %v581_v61 = vadd.f32 0.5, %v580_v59  ;;  %v555_v63 = vpop.f32.mrf.mxu2  ;;  %v568_v0 = vpop.f32.mrf.mxu3 }
 0x296   :  { %v1189_v1 = vpop.eup %1188 }
 0x297   :  { %v587_v2 = vmul.f32 %v581_v61, %v1611_v47  ;;  %v588_v4 = vmul.f32 %v1189_v1, %v577_v60  ;;  %v593_v47 = vld [vmem:[#allocation4 + $0x40] sm:$0xff] }
 0x298   :  { %v1191_v6 = vpop.eup %1190  ;;  %v595_v20 = vunpack.c.l.bf16 %v593_v47  ;;  %v596_v22 = vunpack.c.h.bf16 %v593_v47 }
 0x299   :  { %v1647_v54 = vadd.f32 %v588_v4, %v587_v2  ;;  %v585_v11 = vmul.f32 0.5, %v1191_v6 }
 0x29b   :  { %1192 = vtanh.f32 %v1647_v54  ;;  %v586_v13 = vadd.f32 0.5, %v585_v11 }
 0x2a1   :  { %v1193_v14 = vpop.eup %1192 }
 0x2a2   :  { %v591_v18 = vmul.f32 %v1193_v14, %v586_v13 }
 0x2a4   :  { %v599_v19 = vpack.c.bf16 %v591_v18, %v591_v18 }
 0x2a6   :  { %608 = vmatmul.bf16.vlgmr.msra.gmra.mxu0 %v599_v19  ;;  %621 = vmatmul.bf16.vlgmr.msra.gmra.mxu1 %v599_v19 }
 0x2a7   :  { %634 = vmatmul.bf16.vlgmr.msra.gmra.mxu2 %v599_v19  ;;  %647 = vmatmul.bf16.vlgmr.msra.gmra.mxu3 %v599_v19 }
 0x2a8   :  { %764 = vmatpush.bf16.msra.mxu0 %v1379_v3  ;;  %777 = vmatpush.bf16.msra.mxu1 %v1381_v7 }
 0x2a9   :  { %790 = vmatpush.bf16.msra.mxu2 %v1383_v8  ;;  %803 = vmatpush.bf16.msra.mxu3 %v1386_v12 }
 0x2ac   :  { %765 = vmatpush.bf16.msra.mxu0 %v1390_v16  ;;  %778 = vmatpush.bf16.msra.mxu1 %v1392_v17 }
 0x2ad   :  { %791 = vmatpush.bf16.msra.mxu2 %v1395_v21  ;;  %804 = vmatpush.bf16.msra.mxu3 %v1397_v25 }
 0x2b0   :  { %766 = vmatpush.bf16.msra.mxu0 %v1400_v29  ;;  %779 = vmatpush.bf16.msra.mxu1 %v1404_v33 }
 0x2b1   :  { %792 = vmatpush.bf16.msra.mxu2 %v1406_v34  ;;  %805 = vmatpush.bf16.msra.mxu3 %v1409_v38 }
 0x2b4   :  { %767 = vmatpush.bf16.msra.mxu0 %v1412_v44  ;;  %780 = vmatpush.bf16.msra.mxu1 %v1416_v45 }
 0x2b5   :  { %793 = vmatpush.bf16.msra.mxu2 %v1418_v46  ;;  %806 = vmatpush.bf16.msra.mxu3 %v1421_v50 }
 0x2b8   :  { %768 = vmatpush.bf16.msra.mxu0 %v1424_v56  ;;  %781 = vmatpush.bf16.msra.mxu1 %v1428_v57 }
 0x2b9   :  { %794 = vmatpush.bf16.msra.mxu2 %v1430_v58  ;;  %807 = vmatpush.bf16.msra.mxu3 %v1433_v62 }
 0x2bc   :  { %769 = vmatpush.bf16.msra.mxu0 %v1436_v5  ;;  %782 = vmatpush.bf16.msra.mxu1 %v1440_v9 }
 0x2bd   :  { %795 = vmatpush.bf16.msra.mxu2 %v1442_v10  ;;  %808 = vmatpush.bf16.msra.mxu3 %v1445_v15 }
 0x2c0   :  { %770 = vmatpush.bf16.msra.mxu0 %v1448_v23  ;;  %783 = vmatpush.bf16.msra.mxu1 %v1452_v24 }
 0x2c1   :  { %796 = vmatpush.bf16.msra.mxu2 %v1454_v26  ;;  %809 = vmatpush.bf16.msra.mxu3 %v1457_v31 }
 0x2c4   :  { %771 = vmatpush.bf16.msra.mxu0 %v1460_v40  ;;  %784 = vmatpush.bf16.msra.mxu1 %v1464_v41 }
 0x2c5   :  { %797 = vmatpush.bf16.msra.mxu2 %v1466_v42  ;;  %810 = vmatpush.bf16.msra.mxu3 %v1469_v43 }
 0x323   :  { %v609_v27 = vpop.f32.mrf.mxu0  ;;  %v622_v28 = vpop.f32.mrf.mxu1 }
 0x324   :  { %v652_v30 = vadd.f32 %v609_v27, %v595_v20  ;;  %v653_v32 = vadd.f32 %v622_v28, %v596_v22 }
 0x326   :  { %v656_v36 = vmul.f32 0.5, %v652_v30  ;;  %v660_v37 = vmul.f32 0.5, %v653_v32 }
 0x328   :  { %1194 = vtanh.f32 %v656_v36 }
 0x329   :  { %1196 = vtanh.f32 %v660_v37 }
 0x32a   :  { %v635_v49 = vpop.f32.mrf.mxu2  ;;  %v648_v51 = vpop.f32.mrf.mxu3 }
 0x32b   :  { %v654_v52 = vadd.f32 %v635_v49, %v597_v39  ;;  %v655_v53 = vadd.f32 %v648_v51, %v598_v48  ;;  %v611_v55 = vpop.f32.mrf.mxu0  ;;  %v624_v59 = vpop.f32.mrf.mxu1  ;;  %v757_v39 = vld [vmem:[#allocation4 + $0x60] sm:$0xff] }
 0x32c   :  { %v759_v48 = vunpack.c.l.bf16 %v757_v39  ;;  %v760_v49 = vunpack.c.h.bf16 %v757_v39  ;;  %v758_v59 = vld [vmem:[#allocation4 + $0x68] sm:$0xff] }
 0x32d   :  { %1198 = vtanh.f32 %v654_v52  ;;  %v665_v60 = vmul.f32 0.5, %v655_v53 }
 0x32e   :  { %v1195_v61 = vpop.eup %1194 }
 0x32f   :  { %v1197_v63 = vpop.eup %1196  ;;  %v658_v0 = vmul.f32 0.5, %v1195_v61  ;;  %1200 = vtanh.f32 %v665_v60  ;;  %v940_v60 = vld [vmem:[#allocation9 + $0x78] sm:$0xff] }
 0x330   :  { %v662_v1 = vmul.f32 0.5, %v1197_v63 }
 0x331   :  { %v659_v2 = vadd.f32 0.5, %v658_v0  ;;  %v761_v0 = vunpack.c.l.bf16 %v758_v59 }
 0x332   :  { %v663_v4 = vadd.f32 0.5, %v662_v1  ;;  %v637_v6 = vpop.f32.mrf.mxu2  ;;  %v650_v11 = vpop.f32.mrf.mxu3  ;;  %v762_v1 = vunpack.c.h.bf16 %v758_v59 }
 0x333   :  { %v1199_v13 = vpop.eup %1198 }
 0x334   :  { %v669_v14 = vmul.f32 %v663_v4, %v1647_v54  ;;  %v670_v18 = vmul.f32 %v1199_v13, %v659_v2 }
 0x335   :  { %v1201_v19 = vpop.eup %1200 }
 0x336   :  { %v1683_v47 = vadd.f32 %v670_v18, %v669_v14  ;;  %v667_v20 = vmul.f32 0.5, %v1201_v19 }
 0x338   :  { %1202 = vtanh.f32 %v1683_v47  ;;  %v668_v22 = vadd.f32 0.5, %v667_v20 }
 0x33e   :  { %v1203_v27 = vpop.eup %1202 }
 0x33f   :  { %v673_v28 = vmul.f32 %v1203_v27, %v668_v22 }
 0x341   :  { %v681_v30 = vpack.c.bf16 %v673_v28, %v673_v28 }
 0x343   :  { %690 = vmatmul.bf16.vlgmr.msrb.gmra.mxu0 %v681_v30  ;;  %703 = vmatmul.bf16.vlgmr.msrb.gmra.mxu1 %v681_v30 }
 0x344   :  { %716 = vmatmul.bf16.vlgmr.msrb.gmra.mxu2 %v681_v30  ;;  %729 = vmatmul.bf16.vlgmr.msrb.gmra.mxu3 %v681_v30 }
 0x345   :  { %846 = vmatpush.bf16.msrb.mxu0 %v1379_v3  ;;  %859 = vmatpush.bf16.msrb.mxu1 %v1381_v7  ;;  %v675_v3 = vld [vmem:[#allocation4 + $0x50] sm:$0xff] }
 0x346   :  { %872 = vmatpush.bf16.msrb.mxu2 %v1383_v8  ;;  %885 = vmatpush.bf16.msrb.mxu3 %v1386_v12  ;;  %v677_v7 = vunpack.c.l.bf16 %v675_v3  ;;  %v678_v8 = vunpack.c.h.bf16 %v675_v3 }
 0x349   :  { %847 = vmatpush.bf16.msrb.mxu0 %v1390_v16  ;;  %860 = vmatpush.bf16.msrb.mxu1 %v1392_v17 }
 0x34a   :  { %873 = vmatpush.bf16.msrb.mxu2 %v1395_v21  ;;  %886 = vmatpush.bf16.msrb.mxu3 %v1397_v25  ;;  %v676_v25 = vld [vmem:[#allocation4 + $0x58] sm:$0xff] }
 0x34d   :  { %848 = vmatpush.bf16.msrb.mxu0 %v1400_v29  ;;  %861 = vmatpush.bf16.msrb.mxu1 %v1404_v33 }
 0x34e   :  { %874 = vmatpush.bf16.msrb.mxu2 %v1406_v34  ;;  %887 = vmatpush.bf16.msrb.mxu3 %v1409_v38  ;;  %v679_v34 = vunpack.c.l.bf16 %v676_v25  ;;  %v680_v38 = vunpack.c.h.bf16 %v676_v25 }
 0x351   :  { %849 = vmatpush.bf16.msrb.mxu0 %v1412_v44  ;;  %862 = vmatpush.bf16.msrb.mxu1 %v1416_v45 }
 0x352   :  { %875 = vmatpush.bf16.msrb.mxu2 %v1418_v46  ;;  %888 = vmatpush.bf16.msrb.mxu3 %v1421_v50 }
 0x355   :  { %850 = vmatpush.bf16.msrb.mxu0 %v1424_v56  ;;  %863 = vmatpush.bf16.msrb.mxu1 %v1428_v57 }
 0x356   :  { %876 = vmatpush.bf16.msrb.mxu2 %v1430_v58  ;;  %889 = vmatpush.bf16.msrb.mxu3 %v1433_v62 }
 0x359   :  { %851 = vmatpush.bf16.msrb.mxu0 %v1436_v5  ;;  %864 = vmatpush.bf16.msrb.mxu1 %v1440_v9 }
 0x35a   :  { %877 = vmatpush.bf16.msrb.mxu2 %v1442_v10  ;;  %890 = vmatpush.bf16.msrb.mxu3 %v1445_v15 }
 0x35d   :  { %852 = vmatpush.bf16.msrb.mxu0 %v1448_v23  ;;  %865 = vmatpush.bf16.msrb.mxu1 %v1452_v24 }
 0x35e   :  { %878 = vmatpush.bf16.msrb.mxu2 %v1454_v26  ;;  %891 = vmatpush.bf16.msrb.mxu3 %v1457_v31 }
 0x361   :  { %853 = vmatpush.bf16.msrb.mxu0 %v1460_v40  ;;  %866 = vmatpush.bf16.msrb.mxu1 %v1464_v41 }
 0x362   :  { %879 = vmatpush.bf16.msrb.mxu2 %v1466_v42  ;;  %892 = vmatpush.bf16.msrb.mxu3 %v1469_v43 }
 0x3c0   :  { %v691_v12 = vpop.f32.mrf.mxu0  ;;  %v704_v16 = vpop.f32.mrf.mxu1 }
 0x3c1   :  { %v734_v17 = vadd.f32 %v691_v12, %v677_v7  ;;  %v735_v21 = vadd.f32 %v704_v16, %v678_v8 }
 0x3c3   :  { %v738_v29 = vmul.f32 0.5, %v734_v17  ;;  %v742_v33 = vmul.f32 0.5, %v735_v21 }
 0x3c5   :  { %1204 = vtanh.f32 %v738_v29 }
 0x3c6   :  { %1206 = vtanh.f32 %v742_v33 }
 0x3c7   :  { %v717_v44 = vpop.f32.mrf.mxu2  ;;  %v730_v45 = vpop.f32.mrf.mxu3 }
 0x3c8   :  { %v736_v46 = vadd.f32 %v717_v44, %v679_v34  ;;  %v737_v50 = vadd.f32 %v730_v45, %v680_v38  ;;  %v693_v56 = vpop.f32.mrf.mxu0  ;;  %v706_v57 = vpop.f32.mrf.mxu1  ;;  %v939_v38 = vld [vmem:[#allocation9 + $0x70] sm:$0xff]  ;;  %v938_v44 = vld [vmem:[#allocation9 + $0x68] sm:$0xff]  ;;  %v937_v45 = vld [vmem:[#allocation9 + $0x60] sm:$0xff] }
 0x3c9   :  { %v934_v56 = vld [vmem:[#allocation9 + $0x48] sm:$0xff]  ;;  %v933_v57 = vld [vmem:[#allocation9 + $0x40] sm:$0xff] }
 0x3ca   :  { %1208 = vtanh.f32 %v736_v46  ;;  %v747_v58 = vmul.f32 0.5, %v737_v50  ;;  %v936_v46 = vld [vmem:[#allocation9 + $0x58] sm:$0xff]  ;;  %v935_v50 = vld [vmem:[#allocation9 + $0x50] sm:$0xff] }
 0x3cb   :  { %v1205_v62 = vpop.eup %1204 }
 0x3cc   :  { %v1207_v5 = vpop.eup %1206  ;;  %v740_v9 = vmul.f32 0.5, %v1205_v62  ;;  %1210 = vtanh.f32 %v747_v58  ;;  %v932_v58 = vld [vmem:[#allocation9 + $0x38] sm:$0xff]  ;;  %v931_v62 = vld [vmem:[#allocation9 + $0x30] sm:$0xff] }
 0x3cd   :  { %v744_v10 = vmul.f32 0.5, %v1207_v5  ;;  %v930_v5 = vld [vmem:[#allocation9 + $0x28] sm:$0xff] }
 0x3ce   :  { %v741_v15 = vadd.f32 0.5, %v740_v9  ;;  %v929_v9 = vld [vmem:[#allocation9 + $0x20] sm:$0xff] }
 0x3cf   :  { %v745_v23 = vadd.f32 0.5, %v744_v10  ;;  %v719_v24 = vpop.f32.mrf.mxu2  ;;  %v732_v26 = vpop.f32.mrf.mxu3  ;;  %v928_v10 = vld [vmem:[#allocation9 + $0x18] sm:$0xff] }
 0x3d0   :  { %v1209_v31 = vpop.eup %1208  ;;  %v926_v24 = vld [vmem:[#allocation9 + $0x8] sm:$0xff]  ;;  %v925_v26 = vld [vmem:[#allocation9] sm:$0xff] }
 0x3d1   :  { %v751_v40 = vmul.f32 %v745_v23, %v1683_v47  ;;  %v752_v41 = vmul.f32 %v1209_v31, %v741_v15  ;;  %v927_v15 = vld [vmem:[#allocation9 + $0x10] sm:$0xff] }
 0x3d2   :  { %v1211_v42 = vpop.eup %1210  ;;  %v839_v23 = vld [vmem:[#allocation4 + $0x70] sm:$0xff] }
 0x3d3   :  { %v753_v43 = vadd.f32 %v752_v41, %v751_v40  ;;  %v749_v54 = vmul.f32 0.5, %v1211_v42  ;;  %v841_v31 = vunpack.c.l.bf16 %v839_v23  ;;  %v842_v40 = vunpack.c.h.bf16 %v839_v23 }
 0x3d5   :  { %1212 = vtanh.f32 %v753_v43  ;;  %v750_v32 = vadd.f32 0.5, %v749_v54 }
 0x3db   :  { %v1213_v35 = vpop.eup %1212 }
 0x3dc   :  { %v755_v36 = vmul.f32 %v1213_v35, %v750_v32  ;;  %v840_v32 = vld [vmem:[#allocation4 + $0x78] sm:$0xff] }
 0x3dd   :  { %v844_v39 = vunpack.c.h.bf16 %v840_v32 }
 0x3de   :  { %v763_v37 = vpack.c.bf16 %v755_v36, %v755_v36 }
 0x3e0   :  { %772 = vmatmul.bf16.vlgmr.msra.gmra.mxu0 %v763_v37  ;;  %785 = vmatmul.bf16.vlgmr.msra.gmra.mxu1 %v763_v37 }
 0x3e1   :  { %798 = vmatmul.bf16.vlgmr.msra.gmra.mxu2 %v763_v37  ;;  %811 = vmatmul.bf16.vlgmr.msra.gmra.mxu3 %v763_v37  ;;  %v843_v37 = vunpack.c.l.bf16 %v840_v32 }
 0x3e2   :  { %945 = vmatpush.msra.mxu0 %v940_v60 }
 0x3e4   :  { %946 = vmatpush.msra.mxu0 %v939_v38 }
 0x3e6   :  { %947 = vmatpush.msra.mxu0 %v938_v44 }
 0x3e8   :  { %948 = vmatpush.msra.mxu0 %v937_v45 }
 0x3ea   :  { %949 = vmatpush.msra.mxu0 %v936_v46 }
 0x3ec   :  { %950 = vmatpush.msra.mxu0 %v935_v50 }
 0x3ee   :  { %951 = vmatpush.msra.mxu0 %v934_v56 }
 0x3f0   :  { %952 = vmatpush.msra.mxu0 %v933_v57 }
 0x3f2   :  { %953 = vmatpush.msra.mxu0 %v932_v58 }
 0x3f4   :  { %954 = vmatpush.msra.mxu0 %v931_v62 }
 0x3f6   :  { %955 = vmatpush.msra.mxu0 %v930_v5 }
 0x3f8   :  { %956 = vmatpush.msra.mxu0 %v929_v9 }
 0x3fa   :  { %957 = vmatpush.msra.mxu0 %v928_v10 }
 0x3fc   :  { %958 = vmatpush.msra.mxu0 %v927_v15 }
 0x3fe   :  { %959 = vmatpush.msra.mxu0 %v926_v24 }
 0x400   :  { %960 = vmatpush.msra.mxu0 %v925_v26 }
 0x45d   :  { %v773_v51 = vpop.f32.mrf.mxu0  ;;  %v786_v52 = vpop.f32.mrf.mxu1 }
 0x45e   :  { %v816_v53 = vadd.f32 %v773_v51, %v759_v48  ;;  %v817_v55 = vadd.f32 %v786_v52, %v760_v49 }
 0x460   :  { %v820_v61 = vmul.f32 0.5, %v816_v53  ;;  %v824_v63 = vmul.f32 0.5, %v817_v55 }
 0x462   :  { %1214 = vtanh.f32 %v820_v61 }
 0x463   :  { %1216 = vtanh.f32 %v824_v63 }
 0x464   :  { %v799_v2 = vpop.f32.mrf.mxu2  ;;  %v812_v4 = vpop.f32.mrf.mxu3 }
 0x465   :  { %v818_v6 = vadd.f32 %v799_v2, %v761_v0  ;;  %v819_v11 = vadd.f32 %v812_v4, %v762_v1  ;;  %v775_v13 = vpop.f32.mrf.mxu0  ;;  %v788_v14 = vpop.f32.mrf.mxu1 }
 0x467   :  { %1218 = vtanh.f32 %v818_v6  ;;  %v829_v18 = vmul.f32 0.5, %v819_v11 }
 0x468   :  { %v1215_v19 = vpop.eup %1214 }
 0x469   :  { %v1217_v47 = vpop.eup %1216  ;;  %v822_v20 = vmul.f32 0.5, %v1215_v19  ;;  %1220 = vtanh.f32 %v829_v18 }
 0x46a   :  { %v826_v22 = vmul.f32 0.5, %v1217_v47 }
 0x46b   :  { %v823_v27 = vadd.f32 0.5, %v822_v20 }
 0x46c   :  { %v827_v28 = vadd.f32 0.5, %v826_v22  ;;  %v801_v30 = vpop.f32.mrf.mxu2  ;;  %v814_v3 = vpop.f32.mrf.mxu3 }
 0x46d   :  { %v1219_v7 = vpop.eup %1218 }
 0x46e   :  { %v833_v8 = vmul.f32 %v827_v28, %v753_v43  ;;  %v834_v12 = vmul.f32 %v1219_v7, %v823_v27  ;;  %v1153_v28 = vld [vmem:[%s1732_s3] ss:$0 sm:$0xff] }
 0x46f   :  { %v1221_v16 = vpop.eup %1220 }
 0x470   :  { %v1719_v17 = vadd.f32 %v834_v12, %v833_v8  ;;  %v831_v21 = vmul.f32 0.5, %v1221_v16 }
 0x472   :  { %1222 = vtanh.f32 %v1719_v17  ;;  %v832_v25 = vadd.f32 0.5, %v831_v21 }
 0x478   :  { %v1223_v29 = vpop.eup %1222 }
 0x479   :  { %v837_v33 = vmul.f32 %v1223_v29, %v832_v25 }
 0x47b   :  { %v845_v34 = vpack.c.bf16 %v837_v33, %v837_v33 }
 0x47d   :  { %854 = vmatmul.bf16.vlgmr.msrb.gmra.mxu0 %v845_v34  ;;  %867 = vmatmul.bf16.vlgmr.msrb.gmra.mxu1 %v845_v34 }
 0x47e   :  { %880 = vmatmul.bf16.vlgmr.msrb.gmra.mxu2 %v845_v34  ;;  %893 = vmatmul.bf16.vlgmr.msrb.gmra.mxu3 %v845_v34 }
 0x4fa   :  { %v855_v41 = vpop.f32.mrf.mxu0  ;;  %v868_v42 = vpop.f32.mrf.mxu1 }
 0x4fb   :  { %v898_v43 = vadd.f32 %v855_v41, %v841_v31  ;;  %v899_v54 = vadd.f32 %v868_v42, %v842_v40 }
 0x4fd   :  { %v902_v35 = vmul.f32 0.5, %v898_v43  ;;  %v906_v36 = vmul.f32 0.5, %v899_v54 }
 0x4ff   :  { %1224 = vtanh.f32 %v902_v35 }
 0x500   :  { %1226 = vtanh.f32 %v906_v36 }
 0x501   :  { %v881_v48 = vpop.f32.mrf.mxu2  ;;  %v894_v49 = vpop.f32.mrf.mxu3 }
 0x502   :  { %v900_v51 = vadd.f32 %v881_v48, %v843_v37  ;;  %v901_v52 = vadd.f32 %v894_v49, %v844_v39  ;;  %v857_v53 = vpop.f32.mrf.mxu0  ;;  %v870_v55 = vpop.f32.mrf.mxu1 }
 0x504   :  { %1228 = vtanh.f32 %v900_v51  ;;  %v911_v59 = vmul.f32 0.5, %v901_v52 }
 0x505   :  { %v1225_v60 = vpop.eup %1224 }
 0x506   :  { %v1227_v61 = vpop.eup %1226  ;;  %v904_v63 = vmul.f32 0.5, %v1225_v60  ;;  %1230 = vtanh.f32 %v911_v59 }
 0x507   :  { %v908_v0 = vmul.f32 0.5, %v1227_v61 }
 0x508   :  { %v905_v1 = vadd.f32 0.5, %v904_v63 }
 0x509   :  { %v909_v2 = vadd.f32 0.5, %v908_v0  ;;  %v883_v4 = vpop.f32.mrf.mxu2  ;;  %v896_v6 = vpop.f32.mrf.mxu3 }
 0x50a   :  { %v1229_v11 = vpop.eup %1228 }
 0x50b   :  { %v915_v13 = vmul.f32 %v909_v2, %v1719_v17  ;;  %v916_v14 = vmul.f32 %v1229_v11, %v905_v1 }
 0x50c   :  { %v1231_v18 = vpop.eup %1230 }
 0x50d   :  { %v917_v19 = vadd.f32 %v916_v14, %v915_v13  ;;  %v913_v47 = vmul.f32 0.5, %v1231_v18 }
 0x50f   :  { %1232 = vtanh.f32 %v917_v19  ;;  %v914_v20 = vadd.f32 0.5, %v913_v47 }
 0x515   :  { %v1233_v22 = vpop.eup %1232 }
 0x516   :  { %v919_v27 = vmul.f32 %v1233_v22, %v914_v20 }
 0x518   :  { %961 = vmatmul.f32.vlgmr.msra.gmra.mxu0 %v919_v27 }
 0x595   :  { %v962_v30 = vpop.f32.mrf.mxu0 }
 0x596   :  { %v963_v3 = vadd.f32 %v1153_v28, %v962_v30 }
 0x598   :  { %965 = vst [vmem:[#allocation10] sm:$0xff] %v963_v3 }
 0x599   :  { %976 = dma.vmem_to_hbm [thread:$0]  %s972_s8, 128, %s974_s11, [#allocation6]  }
 0x59a   :  { %1334 = dma.done.wait [#allocation6], 128  }
 0x59b   :  { %1335 = vsyncadd [#allocation6], 4294967168 }
 0x59c   :  { %981 = vsyncpa [#allocation5], 1 }
 0x59d   :  { %982 = vsyncpa [#allocation8], 1 }
 0x59e   :  { %983 = vsyncpa [#allocation6], 1 }

</bundles_post_ra>
